<compile_context>
chip_gen: v7x
topology: tpu7x:2x2x1
jax: 0.10.0
libtpu: 0.0.40
codegen_flags: <defaults>
</compile_context>

<pallas_src>
import functools

import jax
import jax.numpy as jnp
from jax import lax
from jax.experimental import pallas as pl
from jax.experimental.pallas import tpu as pltpu

INPUT_SIZE = 500
HIDDEN = 128
FC1 = 32
NUM_CLASSES = 10
GATES = 4 * HIDDEN  # 512


def _round_up(x, m):
    return (x + m - 1) // m * m


def _pick_time_block(T, max_tb):
    """Largest divisor of T that is <= max_tb (amortizes per-grid-step overhead)."""
    tb = 1
    for cand in range(1, min(T, max(1, max_tb)) + 1):
        if T % cand == 0:
            tb = cand
    return tb


# ---------------------------------------------------------------------------
# Fused kernel: input projection + LSTM recurrence + FC head + log-softmax.
#
# Grid = (batch_blocks, time_blocks); time is the serial ("arbitrary") axis,
# batch blocks are "parallel".  h/c live in VMEM scratch across time blocks.
# ---------------------------------------------------------------------------
def _fused_lstm_kernel(x_ref, wih_ref, whh_ref, b_ref,
                       w1_ref, b1_ref, w2_ref, b2_ref,
                       out_ref, h_sc, c_sc, gx_sc, *, tb, unroll):
    t_blk = pl.program_id(1)

    @pl.when(t_blk == 0)
    def _():
        h_sc[...] = jnp.zeros_like(h_sc)
        c_sc[...] = jnp.zeros_like(c_sc)

    _, bb, d_pad = x_ref.shape

    # --- Fused input projection for all tb timesteps of this block:
    #     ONE (tb*bb, d_pad) x (d_pad, 512) matmul (MXU-friendly M), staged to
    #     VMEM scratch so the step loop reads lane/sublane-aligned slices.
    x2d = x_ref[...].reshape(tb * bb, d_pad)               # layout-preserving collapse
    gx = jnp.dot(x2d, wih_ref[...],
                 preferred_element_type=jnp.float32) + b_ref[...]
    gx_sc[...] = gx.reshape(tb, bb, GATES)

    whh = whh_ref[...]  # resident recurrent weight (f32), loaded once per block

    def step(t, carry):
        h, c = carry
        gates = gx_sc[t] + jnp.dot(h, whh, preferred_element_type=jnp.float32)
        i_g = jax.nn.sigmoid(gates[:, 0 * HIDDEN:1 * HIDDEN])
        f_g = jax.nn.sigmoid(gates[:, 1 * HIDDEN:2 * HIDDEN])
        g_g = jnp.tanh(gates[:, 2 * HIDDEN:3 * HIDDEN])
        o_g = jax.nn.sigmoid(gates[:, 3 * HIDDEN:4 * HIDDEN])
        c_new = f_g * c + i_g * g_g
        h_new = o_g * jnp.tanh(c_new)
        return (h_new, c_new)

    h_f, c_f = lax.fori_loop(0, tb, step, (h_sc[...], c_sc[...]), unroll=unroll)
    h_sc[...] = h_f
    c_sc[...] = c_f

    @pl.when(t_blk == pl.num_programs(1) - 1)
    def _():
        # Fused head on the final hidden state:
        # Linear(128->32) -> Dropout(eval: identity) -> Linear(32->10) -> LogSoftmax.
        y = jnp.dot(h_f, w1_ref[...], preferred_element_type=jnp.float32) + b1_ref[...]
        z = jnp.dot(y, w2_ref[...], preferred_element_type=jnp.float32) + b2_ref[...]
        z_max = jnp.max(z, axis=-1, keepdims=True)
        shifted = z - z_max
        lse = jnp.log(jnp.sum(jnp.exp(shifted), axis=-1, keepdims=True))
        out_ref[...] = shifted - lse


# ---------------------------------------------------------------------------
# Wrapper
# ---------------------------------------------------------------------------
@functools.partial(jax.jit, static_argnames=("matmul_dtype",))
def rnn_forward(x_btd, params, matmul_dtype=jnp.float32):
    """x_btd: (B, T, 500) float32 (PyTorch batch_first layout) -> (B, 10) log-probs."""
    wih, whh, b, w1, b1, w2, b2 = params
    B, T, D = x_btd.shape
    assert D == INPUT_SIZE

    d_pad = _round_up(D, 128)   # 500 -> 512: clean 128-lane K tiling
    b_pad = _round_up(B, 8)     # f32 sublane

    # Generation-aware batch blocking: keep ONE batch block (large MXU M, no
    # extra grid steps) up to 256 rows; only very large batches split into
    # 256-row blocks, which the "parallel" axis can shard across v7x's 2 TCs.
    if b_pad <= 256:
        bb = b_pad
    else:
        bb = 256
        b_pad = _round_up(b_pad, bb)
    nb = b_pad // bb

    # One wrapper-side copy: time-major transpose + zero-pad batch/feature dims
    # (padded rows/lanes are inert; outputs sliced back to B below).
    x_tbd = jnp.transpose(x_btd, (1, 0, 2))
    x_tbd = jnp.pad(x_tbd, ((0, 0), (0, b_pad - B), (0, d_pad - D)))
    wih_pad = jnp.pad(wih, ((0, d_pad - D), (0, 0)))
    if matmul_dtype != jnp.float32:
        # bf16 (v6e/v7x) applies ONLY to the hoisted input projection operands;
        # the recurrent h @ W_hh and gate math stay f32 for accuracy.
        x_tbd = x_tbd.astype(matmul_dtype)
        wih_pad = wih_pad.astype(matmul_dtype)

    # Time block size against a conservative VMEM working-set budget
    # (x block double-buffered + gates scratch), safe under v5e's 16 MiB
    # scoped-VMEM default; resident weights counted at double-buffer worst case.
    x_item = jnp.dtype(matmul_dtype).itemsize
    budget = 10 << 20
    resident = 2 * d_pad * GATES * x_item + 2 * HIDDEN * GATES * 4 + (256 << 10)
    per_tb = bb * (2 * d_pad * x_item + GATES * 4)
    max_tb = max(1, (budget - resident) // per_tb)
    tb = _pick_time_block(T, min(32, max_tb))
    nt = T // tb
    # Full unroll only when the per-step working set is tiny; otherwise a
    # moderate unroll avoids vreg spills at large bb.
    unroll = True if bb <= 16 else min(tb, 8)

    out = pl.pallas_call(
        functools.partial(_fused_lstm_kernel, tb=tb, unroll=unroll),
        out_shape=jax.ShapeDtypeStruct((b_pad, NUM_CLASSES), jnp.float32),
        grid_spec=pltpu.PrefetchScalarGridSpec(
            num_scalar_prefetch=0,
            grid=(nb, nt),
            in_specs=[
                pl.BlockSpec((tb, bb, d_pad), lambda bi, ti: (ti, bi, 0)),  # x (time-major)
                pl.BlockSpec((d_pad, GATES), lambda bi, ti: (0, 0)),        # W_ih^T (resident)
                pl.BlockSpec((HIDDEN, GATES), lambda bi, ti: (0, 0)),       # W_hh^T (resident)
                pl.BlockSpec((1, GATES), lambda bi, ti: (0, 0)),            # fused LSTM bias
                pl.BlockSpec((HIDDEN, FC1), lambda bi, ti: (0, 0)),         # head W1
                pl.BlockSpec((1, FC1), lambda bi, ti: (0, 0)),              # head b1
                pl.BlockSpec((FC1, NUM_CLASSES), lambda bi, ti: (0, 0)),    # head W2
                pl.BlockSpec((1, NUM_CLASSES), lambda bi, ti: (0, 0)),      # head b2
            ],
            out_specs=pl.BlockSpec((bb, NUM_CLASSES), lambda bi, ti: (bi, 0)),
            scratch_shapes=[
                pltpu.VMEM((bb, HIDDEN), jnp.float32),       # h carried across time blocks
                pltpu.VMEM((bb, HIDDEN), jnp.float32),       # c carried across time blocks
                pltpu.VMEM((tb, bb, GATES), jnp.float32),    # per-block input-projection gates
            ],
        ),
        compiler_params=pltpu.CompilerParams(
            dimension_semantics=("parallel", "arbitrary")),  # batch parallel, time serial
    )(x_tbd, wih_pad, whh, b, w1, b1, w2, b2)
    return out[:B]


def init_params(key):
    """Deterministic parameter init (shapes match the PyTorch module, transposed)."""
    ks = jax.random.split(key, 8)
    scale = 0.05
    # Stored transposed: (in, out). Gate order along out-axis: [i, f, g, o].
    wih = scale * jax.random.normal(ks[0], (INPUT_SIZE, GATES), jnp.float32)
    whh = scale * jax.random.normal(ks[1], (HIDDEN, GATES), jnp.float32)
    b_ih = scale * jax.random.normal(ks[2], (GATES,), jnp.float32)
    b_hh = scale * jax.random.normal(ks[3], (GATES,), jnp.float32)
    b = (b_ih + b_hh).reshape(1, GATES)
    w1 = scale * jax.random.normal(ks[4], (HIDDEN, FC1), jnp.float32)
    b1 = scale * jax.random.normal(ks[5], (FC1,), jnp.float32).reshape(1, FC1)
    w2 = scale * jax.random.normal(ks[6], (FC1, NUM_CLASSES), jnp.float32)
    b2 = scale * jax.random.normal(ks[7], (NUM_CLASSES,), jnp.float32).reshape(1, NUM_CLASSES)
    return (wih, whh, b, w1, b1, w2, b2)


def reference_forward(x_btd, params):
    """Pure-JAX reference (matches PyTorch LSTM semantics, zero initial state)."""
    wih, whh, b, w1, b1, w2, b2 = params
    B, T, D = x_btd.shape
    hp = lax.Precision.HIGHEST

    def step(carry, x_t):
        h, c = carry
        gates = jnp.dot(x_t, wih, precision=hp) + jnp.dot(h, whh, precision=hp) + b
        i_g = jax.nn.sigmoid(gates[:, 0 * HIDDEN:1 * HIDDEN])
        f_g = jax.nn.sigmoid(gates[:, 1 * HIDDEN:2 * HIDDEN])
        g_g = jnp.tanh(gates[:, 2 * HIDDEN:3 * HIDDEN])
        o_g = jax.nn.sigmoid(gates[:, 3 * HIDDEN:4 * HIDDEN])
        c_n = f_g * c + i_g * g_g
        h_n = o_g * jnp.tanh(c_n)
        return (h_n, c_n), None

    h0 = jnp.zeros((B, HIDDEN), jnp.float32)
    c0 = jnp.zeros((B, HIDDEN), jnp.float32)
    (h_T, _), _ = lax.scan(step, (h0, c0), jnp.transpose(x_btd, (1, 0, 2)))
    y = jnp.dot(h_T, w1, precision=hp) + b1
    z = jnp.dot(y, w2, precision=hp) + b2
    return jax.nn.log_softmax(z, axis=-1)


if __name__ == "__main__":
    key = jax.random.PRNGKey(0)
    k_x, k_p = jax.random.split(key)

    B, T = 2, 8
    x = jax.random.normal(k_x, (B, T, INPUT_SIZE), jnp.float32)
    params = init_params(k_p)

    out = rnn_forward(x, params)
    out = jax.block_until_ready(out)

    ref = reference_forward(x, params)
    assert out.shape == (B, NUM_CLASSES)
    assert jnp.allclose(out, ref, atol=1e-4, rtol=1e-4), "mismatch vs pure-JAX reference"

    print("KERNEL_OK")
</pallas_src>

<mosaic_0001>
module attributes {stable_mosaic.version = 11 : i64} {
  func.func @_fused_lstm_kernel(%arg0: i32, %arg1: i32, %arg2: memref<8x8x512xf32, #tpu.memory_space<vmem>>, %arg3: memref<512x512xf32, #tpu.memory_space<vmem>>, %arg4: memref<128x512xf32, #tpu.memory_space<vmem>>, %arg5: memref<1x512xf32, #tpu.memory_space<vmem>>, %arg6: memref<128x32xf32, #tpu.memory_space<vmem>>, %arg7: memref<1x32xf32, #tpu.memory_space<vmem>>, %arg8: memref<32x10xf32, #tpu.memory_space<vmem>>, %arg9: memref<1x10xf32, #tpu.memory_space<vmem>>, %arg10: memref<8x10xf32, #tpu.memory_space<vmem>>, %arg11: memref<8x128xf32, #tpu.memory_space<vmem>>, %arg12: memref<8x128xf32, #tpu.memory_space<vmem>>, %arg13: memref<8x8x512xf32, #tpu.memory_space<vmem>>) attributes {dimension_semantics = [#tpu.dimension_semantics<parallel>, #tpu.dimension_semantics<arbitrary>], iteration_bounds = array<i64: 1, 1>, scalar_prefetch = 0 : i64, scratch_operands = 3 : i64, tpu.core_type = #tpu.core_type<tc>, window_params = [{transform_indices = @transform_0, window_bounds = array<i64: 8, 8, 512>}, {pipeline_mode = #tpu.pipeline_mode<synchronous>, transform_indices = @transform_1, window_bounds = array<i64: 512, 512>}, {pipeline_mode = #tpu.pipeline_mode<synchronous>, transform_indices = @transform_2, window_bounds = array<i64: 128, 512>}, {pipeline_mode = #tpu.pipeline_mode<synchronous>, transform_indices = @transform_3, window_bounds = array<i64: 1, 512>}, {pipeline_mode = #tpu.pipeline_mode<synchronous>, transform_indices = @transform_4, window_bounds = array<i64: 128, 32>}, {pipeline_mode = #tpu.pipeline_mode<synchronous>, transform_indices = @transform_5, window_bounds = array<i64: 1, 32>}, {pipeline_mode = #tpu.pipeline_mode<synchronous>, transform_indices = @transform_6, window_bounds = array<i64: 32, 10>}, {pipeline_mode = #tpu.pipeline_mode<synchronous>, transform_indices = @transform_7, window_bounds = array<i64: 1, 10>}, {transform_indices = @transform_8, window_bounds = array<i64: 8, 10>}]} {
    %c0_i32 = arith.constant 0 : i32
    %0 = arith.cmpi eq, %arg1, %c0_i32 : i32
    %1 = arith.extui %0 : i1 to i32
    %c0_i32_0 = arith.constant 0 : i32
    %2 = arith.cmpi ne, %1, %c0_i32_0 : i32
    scf.if %2 {
      %cst_71 = arith.constant 0.000000e+00 : f32
      %260 = vector.broadcast %cst_71 : f32 to vector<8x128xf32>
      %c0_72 = arith.constant 0 : index
      %c0_73 = arith.constant 0 : index
      %261 = vector.load %arg11[%c0_72, %c0_73] : memref<8x128xf32, #tpu.memory_space<vmem>>, vector<8x128xf32>
      tpu.vector_store %arg11[%c0_72, %c0_73], %260 {strides = array<i32>} : memref<8x128xf32, #tpu.memory_space<vmem>>, vector<8x128xf32>,
      %cst_74 = arith.constant 0.000000e+00 : f32
      %262 = vector.broadcast %cst_74 : f32 to vector<8x128xf32>
      %c0_75 = arith.constant 0 : index
      %c0_76 = arith.constant 0 : index
      %263 = vector.load %arg12[%c0_75, %c0_76] : memref<8x128xf32, #tpu.memory_space<vmem>>, vector<8x128xf32>
      tpu.vector_store %arg12[%c0_75, %c0_76], %262 {strides = array<i32>} : memref<8x128xf32, #tpu.memory_space<vmem>>, vector<8x128xf32>,
    } else {
    }
    %c0 = arith.constant 0 : index
    %c0_1 = arith.constant 0 : index
    %c0_2 = arith.constant 0 : index
    %3 = vector.load %arg2[%c0, %c0_1, %c0_2] : memref<8x8x512xf32, #tpu.memory_space<vmem>>, vector<8x8x512xf32>
    %4 = vector.shape_cast %3 : vector<8x8x512xf32> to vector<64x512xf32>
    %c0_3 = arith.constant 0 : index
    %c0_4 = arith.constant 0 : index
    %5 = vector.load %arg3[%c0_3, %c0_4] : memref<512x512xf32, #tpu.memory_space<vmem>>, vector<512x512xf32>
    %cst = arith.constant dense<0.000000e+00> : vector<64x512xf32>
    %6 = tpu.matmul %4, %5, %cst {dimension_numbers = #tpu.dot_dimension_numbers<[1], [0], [0], [1], [0, 0, 1, 1], [], []>} : vector<64x512xf32>, vector<512x512xf32>, vector<64x512xf32> -> vector<64x512xf32>
    %c0_5 = arith.constant 0 : index
    %c0_6 = arith.constant 0 : index
    %7 = vector.load %arg5[%c0_5, %c0_6] : memref<1x512xf32, #tpu.memory_space<vmem>>, vector<1x512xf32>
    %8 = vector.broadcast %7 : vector<1x512xf32> to vector<64x512xf32>
    %9 = arith.addf %6, %8 : vector<64x512xf32>
    %10 = vector.shape_cast %9 : vector<64x512xf32> to vector<8x8x512xf32>
    %c0_7 = arith.constant 0 : index
    %c0_8 = arith.constant 0 : index
    %c0_9 = arith.constant 0 : index
    %11 = vector.load %arg13[%c0_7, %c0_8, %c0_9] : memref<8x8x512xf32, #tpu.memory_space<vmem>>, vector<8x8x512xf32>
    tpu.vector_store %arg13[%c0_7, %c0_8, %c0_9], %10 {strides = array<i32>} : memref<8x8x512xf32, #tpu.memory_space<vmem>>, vector<8x8x512xf32>,
    %c0_10 = arith.constant 0 : index
    %c0_11 = arith.constant 0 : index
    %12 = vector.load %arg4[%c0_10, %c0_11] : memref<128x512xf32, #tpu.memory_space<vmem>>, vector<128x512xf32>
    %c0_12 = arith.constant 0 : index
    %c0_13 = arith.constant 0 : index
    %13 = vector.load %arg11[%c0_12, %c0_13] : memref<8x128xf32, #tpu.memory_space<vmem>>, vector<8x128xf32>
    %c0_14 = arith.constant 0 : index
    %c0_15 = arith.constant 0 : index
    %14 = vector.load %arg12[%c0_14, %c0_15] : memref<8x128xf32, #tpu.memory_space<vmem>>, vector<8x128xf32>
    %c0_i32_16 = arith.constant 0 : i32
    %15 = arith.index_cast %c0_i32_16 : i32 to index
    %c0_17 = arith.constant 0 : index
    %c0_18 = arith.constant 0 : index
    %16 = vector.load %arg13[%15, %c0_17, %c0_18] : memref<8x8x512xf32, #tpu.memory_space<vmem>>, vector<1x8x512xf32>
    %17 = vector.shape_cast %16 : vector<1x8x512xf32> to vector<8x512xf32>
    %cst_19 = arith.constant dense<0.000000e+00> : vector<8x512xf32>
    %18 = tpu.matmul %13, %12, %cst_19 {dimension_numbers = #tpu.dot_dimension_numbers<[1], [0], [0], [1], [0, 0, 1, 1], [], []>} : vector<8x128xf32>, vector<128x512xf32>, vector<8x512xf32> -> vector<8x512xf32>
    %19 = arith.addf %17, %18 : vector<8x512xf32>
    %20 = vector.extract_strided_slice %19 {offsets = [0, 0], sizes = [8, 128], strides = [1, 1]} : vector<8x512xf32> to vector<8x128xf32>
    %21 = arith.negf %20 : vector<8x128xf32>
    %22 = math.exp %21 : vector<8x128xf32>
    %cst_20 = arith.constant 1.000000e+00 : f32
    %23 = vector.broadcast %cst_20 : f32 to vector<8x128xf32>
    %24 = arith.addf %23, %22 : vector<8x128xf32>
    %25 = arith.divf %23, %24 : vector<8x128xf32>
    %26 = vector.extract_strided_slice %19 {offsets = [0, 128], sizes = [8, 128], strides = [1, 1]} : vector<8x512xf32> to vector<8x128xf32>
    %27 = arith.negf %26 : vector<8x128xf32>
    %28 = math.exp %27 : vector<8x128xf32>
    %cst_21 = arith.constant 1.000000e+00 : f32
    %29 = vector.broadcast %cst_21 : f32 to vector<8x128xf32>
    %30 = arith.addf %29, %28 : vector<8x128xf32>
    %31 = arith.divf %29, %30 : vector<8x128xf32>
    %32 = vector.extract_strided_slice %19 {offsets = [0, 256], sizes = [8, 128], strides = [1, 1]} : vector<8x512xf32> to vector<8x128xf32>
    %33 = math.tanh %32 : vector<8x128xf32>
    %34 = vector.extract_strided_slice %19 {offsets = [0, 384], sizes = [8, 128], strides = [1, 1]} : vector<8x512xf32> to vector<8x128xf32>
    %35 = arith.negf %34 : vector<8x128xf32>
    %36 = math.exp %35 : vector<8x128xf32>
    %cst_22 = arith.constant 1.000000e+00 : f32
    %37 = vector.broadcast %cst_22 : f32 to vector<8x128xf32>
    %38 = arith.addf %37, %36 : vector<8x128xf32>
    %39 = arith.divf %37, %38 : vector<8x128xf32>
    %40 = arith.mulf %31, %14 : vector<8x128xf32>
    %41 = arith.mulf %25, %33 : vector<8x128xf32>
    %42 = arith.addf %40, %41 : vector<8x128xf32>
    %43 = math.tanh %42 : vector<8x128xf32>
    %44 = arith.mulf %39, %43 : vector<8x128xf32>
    %c1_i32 = arith.constant 1 : i32
    %45 = arith.index_cast %c1_i32 : i32 to index
    %c0_23 = arith.constant 0 : index
    %c0_24 = arith.constant 0 : index
    %46 = vector.load %arg13[%45, %c0_23, %c0_24] : memref<8x8x512xf32, #tpu.memory_space<vmem>>, vector<1x8x512xf32>
    %47 = vector.shape_cast %46 : vector<1x8x512xf32> to vector<8x512xf32>
    %cst_25 = arith.constant dense<0.000000e+00> : vector<8x512xf32>
    %48 = tpu.matmul %44, %12, %cst_25 {dimension_numbers = #tpu.dot_dimension_numbers<[1], [0], [0], [1], [0, 0, 1, 1], [], []>} : vector<8x128xf32>, vector<128x512xf32>, vector<8x512xf32> -> vector<8x512xf32>
    %49 = arith.addf %47, %48 : vector<8x512xf32>
    %50 = vector.extract_strided_slice %49 {offsets = [0, 0], sizes = [8, 128], strides = [1, 1]} : vector<8x512xf32> to vector<8x128xf32>
    %51 = arith.negf %50 : vector<8x128xf32>
    %52 = math.exp %51 : vector<8x128xf32>
    %cst_26 = arith.constant 1.000000e+00 : f32
    %53 = vector.broadcast %cst_26 : f32 to vector<8x128xf32>
    %54 = arith.addf %53, %52 : vector<8x128xf32>
    %55 = arith.divf %53, %54 : vector<8x128xf32>
    %56 = vector.extract_strided_slice %49 {offsets = [0, 128], sizes = [8, 128], strides = [1, 1]} : vector<8x512xf32> to vector<8x128xf32>
    %57 = arith.negf %56 : vector<8x128xf32>
    %58 = math.exp %57 : vector<8x128xf32>
    %cst_27 = arith.constant 1.000000e+00 : f32
    %59 = vector.broadcast %cst_27 : f32 to vector<8x128xf32>
    %60 = arith.addf %59, %58 : vector<8x128xf32>
    %61 = arith.divf %59, %60 : vector<8x128xf32>
    %62 = vector.extract_strided_slice %49 {offsets = [0, 256], sizes = [8, 128], strides = [1, 1]} : vector<8x512xf32> to vector<8x128xf32>
    %63 = math.tanh %62 : vector<8x128xf32>
    %64 = vector.extract_strided_slice %49 {offsets = [0, 384], sizes = [8, 128], strides = [1, 1]} : vector<8x512xf32> to vector<8x128xf32>
    %65 = arith.negf %64 : vector<8x128xf32>
    %66 = math.exp %65 : vector<8x128xf32>
    %cst_28 = arith.constant 1.000000e+00 : f32
    %67 = vector.broadcast %cst_28 : f32 to vector<8x128xf32>
    %68 = arith.addf %67, %66 : vector<8x128xf32>
    %69 = arith.divf %67, %68 : vector<8x128xf32>
    %70 = arith.mulf %61, %42 : vector<8x128xf32>
    %71 = arith.mulf %55, %63 : vector<8x128xf32>
    %72 = arith.addf %70, %71 : vector<8x128xf32>
    %73 = math.tanh %72 : vector<8x128xf32>
    %74 = arith.mulf %69, %73 : vector<8x128xf32>
    %c2_i32 = arith.constant 2 : i32
    %75 = arith.index_cast %c2_i32 : i32 to index
    %c0_29 = arith.constant 0 : index
    %c0_30 = arith.constant 0 : index
    %76 = vector.load %arg13[%75, %c0_29, %c0_30] : memref<8x8x512xf32, #tpu.memory_space<vmem>>, vector<1x8x512xf32>
    %77 = vector.shape_cast %76 : vector<1x8x512xf32> to vector<8x512xf32>
    %cst_31 = arith.constant dense<0.000000e+00> : vector<8x512xf32>
    %78 = tpu.matmul %74, %12, %cst_31 {dimension_numbers = #tpu.dot_dimension_numbers<[1], [0], [0], [1], [0, 0, 1, 1], [], []>} : vector<8x128xf32>, vector<128x512xf32>, vector<8x512xf32> -> vector<8x512xf32>
    %79 = arith.addf %77, %78 : vector<8x512xf32>
    %80 = vector.extract_strided_slice %79 {offsets = [0, 0], sizes = [8, 128], strides = [1, 1]} : vector<8x512xf32> to vector<8x128xf32>
    %81 = arith.negf %80 : vector<8x128xf32>
    %82 = math.exp %81 : vector<8x128xf32>
    %cst_32 = arith.constant 1.000000e+00 : f32
    %83 = vector.broadcast %cst_32 : f32 to vector<8x128xf32>
    %84 = arith.addf %83, %82 : vector<8x128xf32>
    %85 = arith.divf %83, %84 : vector<8x128xf32>
    %86 = vector.extract_strided_slice %79 {offsets = [0, 128], sizes = [8, 128], strides = [1, 1]} : vector<8x512xf32> to vector<8x128xf32>
    %87 = arith.negf %86 : vector<8x128xf32>
    %88 = math.exp %87 : vector<8x128xf32>
    %cst_33 = arith.constant 1.000000e+00 : f32
    %89 = vector.broadcast %cst_33 : f32 to vector<8x128xf32>
    %90 = arith.addf %89, %88 : vector<8x128xf32>
    %91 = arith.divf %89, %90 : vector<8x128xf32>
    %92 = vector.extract_strided_slice %79 {offsets = [0, 256], sizes = [8, 128], strides = [1, 1]} : vector<8x512xf32> to vector<8x128xf32>
    %93 = math.tanh %92 : vector<8x128xf32>
    %94 = vector.extract_strided_slice %79 {offsets = [0, 384], sizes = [8, 128], strides = [1, 1]} : vector<8x512xf32> to vector<8x128xf32>
    %95 = arith.negf %94 : vector<8x128xf32>
    %96 = math.exp %95 : vector<8x128xf32>
    %cst_34 = arith.constant 1.000000e+00 : f32
    %97 = vector.broadcast %cst_34 : f32 to vector<8x128xf32>
    %98 = arith.addf %97, %96 : vector<8x128xf32>
    %99 = arith.divf %97, %98 : vector<8x128xf32>
    %100 = arith.mulf %91, %72 : vector<8x128xf32>
    %101 = arith.mulf %85, %93 : vector<8x128xf32>
    %102 = arith.addf %100, %101 : vector<8x128xf32>
    %103 = math.tanh %102 : vector<8x128xf32>
    %104 = arith.mulf %99, %103 : vector<8x128xf32>
    %c3_i32 = arith.constant 3 : i32
    %105 = arith.index_cast %c3_i32 : i32 to index
    %c0_35 = arith.constant 0 : index
    %c0_36 = arith.constant 0 : index
    %106 = vector.load %arg13[%105, %c0_35, %c0_36] : memref<8x8x512xf32, #tpu.memory_space<vmem>>, vector<1x8x512xf32>
    %107 = vector.shape_cast %106 : vector<1x8x512xf32> to vector<8x512xf32>
    %cst_37 = arith.constant dense<0.000000e+00> : vector<8x512xf32>
    %108 = tpu.matmul %104, %12, %cst_37 {dimension_numbers = #tpu.dot_dimension_numbers<[1], [0], [0], [1], [0, 0, 1, 1], [], []>} : vector<8x128xf32>, vector<128x512xf32>, vector<8x512xf32> -> vector<8x512xf32>
    %109 = arith.addf %107, %108 : vector<8x512xf32>
    %110 = vector.extract_strided_slice %109 {offsets = [0, 0], sizes = [8, 128], strides = [1, 1]} : vector<8x512xf32> to vector<8x128xf32>
    %111 = arith.negf %110 : vector<8x128xf32>
    %112 = math.exp %111 : vector<8x128xf32>
    %cst_38 = arith.constant 1.000000e+00 : f32
    %113 = vector.broadcast %cst_38 : f32 to vector<8x128xf32>
    %114 = arith.addf %113, %112 : vector<8x128xf32>
    %115 = arith.divf %113, %114 : vector<8x128xf32>
    %116 = vector.extract_strided_slice %109 {offsets = [0, 128], sizes = [8, 128], strides = [1, 1]} : vector<8x512xf32> to vector<8x128xf32>
    %117 = arith.negf %116 : vector<8x128xf32>
    %118 = math.exp %117 : vector<8x128xf32>
    %cst_39 = arith.constant 1.000000e+00 : f32
    %119 = vector.broadcast %cst_39 : f32 to vector<8x128xf32>
    %120 = arith.addf %119, %118 : vector<8x128xf32>
    %121 = arith.divf %119, %120 : vector<8x128xf32>
    %122 = vector.extract_strided_slice %109 {offsets = [0, 256], sizes = [8, 128], strides = [1, 1]} : vector<8x512xf32> to vector<8x128xf32>
    %123 = math.tanh %122 : vector<8x128xf32>
    %124 = vector.extract_strided_slice %109 {offsets = [0, 384], sizes = [8, 128], strides = [1, 1]} : vector<8x512xf32> to vector<8x128xf32>
    %125 = arith.negf %124 : vector<8x128xf32>
    %126 = math.exp %125 : vector<8x128xf32>
    %cst_40 = arith.constant 1.000000e+00 : f32
    %127 = vector.broadcast %cst_40 : f32 to vector<8x128xf32>
    %128 = arith.addf %127, %126 : vector<8x128xf32>
    %129 = arith.divf %127, %128 : vector<8x128xf32>
    %130 = arith.mulf %121, %102 : vector<8x128xf32>
    %131 = arith.mulf %115, %123 : vector<8x128xf32>
    %132 = arith.addf %130, %131 : vector<8x128xf32>
    %133 = math.tanh %132 : vector<8x128xf32>
    %134 = arith.mulf %129, %133 : vector<8x128xf32>
    %c4_i32 = arith.constant 4 : i32
    %135 = arith.index_cast %c4_i32 : i32 to index
    %c0_41 = arith.constant 0 : index
    %c0_42 = arith.constant 0 : index
    %136 = vector.load %arg13[%135, %c0_41, %c0_42] : memref<8x8x512xf32, #tpu.memory_space<vmem>>, vector<1x8x512xf32>
    %137 = vector.shape_cast %136 : vector<1x8x512xf32> to vector<8x512xf32>
    %cst_43 = arith.constant dense<0.000000e+00> : vector<8x512xf32>
    %138 = tpu.matmul %134, %12, %cst_43 {dimension_numbers = #tpu.dot_dimension_numbers<[1], [0], [0], [1], [0, 0, 1, 1], [], []>} : vector<8x128xf32>, vector<128x512xf32>, vector<8x512xf32> -> vector<8x512xf32>
    %139 = arith.addf %137, %138 : vector<8x512xf32>
    %140 = vector.extract_strided_slice %139 {offsets = [0, 0], sizes = [8, 128], strides = [1, 1]} : vector<8x512xf32> to vector<8x128xf32>
    %141 = arith.negf %140 : vector<8x128xf32>
    %142 = math.exp %141 : vector<8x128xf32>
    %cst_44 = arith.constant 1.000000e+00 : f32
    %143 = vector.broadcast %cst_44 : f32 to vector<8x128xf32>
    %144 = arith.addf %143, %142 : vector<8x128xf32>
    %145 = arith.divf %143, %144 : vector<8x128xf32>
    %146 = vector.extract_strided_slice %139 {offsets = [0, 128], sizes = [8, 128], strides = [1, 1]} : vector<8x512xf32> to vector<8x128xf32>
    %147 = arith.negf %146 : vector<8x128xf32>
    %148 = math.exp %147 : vector<8x128xf32>
    %cst_45 = arith.constant 1.000000e+00 : f32
    %149 = vector.broadcast %cst_45 : f32 to vector<8x128xf32>
    %150 = arith.addf %149, %148 : vector<8x128xf32>
    %151 = arith.divf %149, %150 : vector<8x128xf32>
    %152 = vector.extract_strided_slice %139 {offsets = [0, 256], sizes = [8, 128], strides = [1, 1]} : vector<8x512xf32> to vector<8x128xf32>
    %153 = math.tanh %152 : vector<8x128xf32>
    %154 = vector.extract_strided_slice %139 {offsets = [0, 384], sizes = [8, 128], strides = [1, 1]} : vector<8x512xf32> to vector<8x128xf32>
    %155 = arith.negf %154 : vector<8x128xf32>
    %156 = math.exp %155 : vector<8x128xf32>
    %cst_46 = arith.constant 1.000000e+00 : f32
    %157 = vector.broadcast %cst_46 : f32 to vector<8x128xf32>
    %158 = arith.addf %157, %156 : vector<8x128xf32>
    %159 = arith.divf %157, %158 : vector<8x128xf32>
    %160 = arith.mulf %151, %132 : vector<8x128xf32>
    %161 = arith.mulf %145, %153 : vector<8x128xf32>
    %162 = arith.addf %160, %161 : vector<8x128xf32>
    %163 = math.tanh %162 : vector<8x128xf32>
    %164 = arith.mulf %159, %163 : vector<8x128xf32>
    %c5_i32 = arith.constant 5 : i32
    %165 = arith.index_cast %c5_i32 : i32 to index
    %c0_47 = arith.constant 0 : index
    %c0_48 = arith.constant 0 : index
    %166 = vector.load %arg13[%165, %c0_47, %c0_48] : memref<8x8x512xf32, #tpu.memory_space<vmem>>, vector<1x8x512xf32>
    %167 = vector.shape_cast %166 : vector<1x8x512xf32> to vector<8x512xf32>
    %cst_49 = arith.constant dense<0.000000e+00> : vector<8x512xf32>
    %168 = tpu.matmul %164, %12, %cst_49 {dimension_numbers = #tpu.dot_dimension_numbers<[1], [0], [0], [1], [0, 0, 1, 1], [], []>} : vector<8x128xf32>, vector<128x512xf32>, vector<8x512xf32> -> vector<8x512xf32>
    %169 = arith.addf %167, %168 : vector<8x512xf32>
    %170 = vector.extract_strided_slice %169 {offsets = [0, 0], sizes = [8, 128], strides = [1, 1]} : vector<8x512xf32> to vector<8x128xf32>
    %171 = arith.negf %170 : vector<8x128xf32>
    %172 = math.exp %171 : vector<8x128xf32>
    %cst_50 = arith.constant 1.000000e+00 : f32
    %173 = vector.broadcast %cst_50 : f32 to vector<8x128xf32>
    %174 = arith.addf %173, %172 : vector<8x128xf32>
    %175 = arith.divf %173, %174 : vector<8x128xf32>
    %176 = vector.extract_strided_slice %169 {offsets = [0, 128], sizes = [8, 128], strides = [1, 1]} : vector<8x512xf32> to vector<8x128xf32>
    %177 = arith.negf %176 : vector<8x128xf32>
    %178 = math.exp %177 : vector<8x128xf32>
    %cst_51 = arith.constant 1.000000e+00 : f32
    %179 = vector.broadcast %cst_51 : f32 to vector<8x128xf32>
    %180 = arith.addf %179, %178 : vector<8x128xf32>
    %181 = arith.divf %179, %180 : vector<8x128xf32>
    %182 = vector.extract_strided_slice %169 {offsets = [0, 256], sizes = [8, 128], strides = [1, 1]} : vector<8x512xf32> to vector<8x128xf32>
    %183 = math.tanh %182 : vector<8x128xf32>
    %184 = vector.extract_strided_slice %169 {offsets = [0, 384], sizes = [8, 128], strides = [1, 1]} : vector<8x512xf32> to vector<8x128xf32>
    %185 = arith.negf %184 : vector<8x128xf32>
    %186 = math.exp %185 : vector<8x128xf32>
    %cst_52 = arith.constant 1.000000e+00 : f32
    %187 = vector.broadcast %cst_52 : f32 to vector<8x128xf32>
    %188 = arith.addf %187, %186 : vector<8x128xf32>
    %189 = arith.divf %187, %188 : vector<8x128xf32>
    %190 = arith.mulf %181, %162 : vector<8x128xf32>
    %191 = arith.mulf %175, %183 : vector<8x128xf32>
    %192 = arith.addf %190, %191 : vector<8x128xf32>
    %193 = math.tanh %192 : vector<8x128xf32>
    %194 = arith.mulf %189, %193 : vector<8x128xf32>
    %c6_i32 = arith.constant 6 : i32
    %195 = arith.index_cast %c6_i32 : i32 to index
    %c0_53 = arith.constant 0 : index
    %c0_54 = arith.constant 0 : index
    %196 = vector.load %arg13[%195, %c0_53, %c0_54] : memref<8x8x512xf32, #tpu.memory_space<vmem>>, vector<1x8x512xf32>
    %197 = vector.shape_cast %196 : vector<1x8x512xf32> to vector<8x512xf32>
    %cst_55 = arith.constant dense<0.000000e+00> : vector<8x512xf32>
    %198 = tpu.matmul %194, %12, %cst_55 {dimension_numbers = #tpu.dot_dimension_numbers<[1], [0], [0], [1], [0, 0, 1, 1], [], []>} : vector<8x128xf32>, vector<128x512xf32>, vector<8x512xf32> -> vector<8x512xf32>
    %199 = arith.addf %197, %198 : vector<8x512xf32>
    %200 = vector.extract_strided_slice %199 {offsets = [0, 0], sizes = [8, 128], strides = [1, 1]} : vector<8x512xf32> to vector<8x128xf32>
    %201 = arith.negf %200 : vector<8x128xf32>
    %202 = math.exp %201 : vector<8x128xf32>
    %cst_56 = arith.constant 1.000000e+00 : f32
    %203 = vector.broadcast %cst_56 : f32 to vector<8x128xf32>
    %204 = arith.addf %203, %202 : vector<8x128xf32>
    %205 = arith.divf %203, %204 : vector<8x128xf32>
    %206 = vector.extract_strided_slice %199 {offsets = [0, 128], sizes = [8, 128], strides = [1, 1]} : vector<8x512xf32> to vector<8x128xf32>
    %207 = arith.negf %206 : vector<8x128xf32>
    %208 = math.exp %207 : vector<8x128xf32>
    %cst_57 = arith.constant 1.000000e+00 : f32
    %209 = vector.broadcast %cst_57 : f32 to vector<8x128xf32>
    %210 = arith.addf %209, %208 : vector<8x128xf32>
    %211 = arith.divf %209, %210 : vector<8x128xf32>
    %212 = vector.extract_strided_slice %199 {offsets = [0, 256], sizes = [8, 128], strides = [1, 1]} : vector<8x512xf32> to vector<8x128xf32>
    %213 = math.tanh %212 : vector<8x128xf32>
    %214 = vector.extract_strided_slice %199 {offsets = [0, 384], sizes = [8, 128], strides = [1, 1]} : vector<8x512xf32> to vector<8x128xf32>
    %215 = arith.negf %214 : vector<8x128xf32>
    %216 = math.exp %215 : vector<8x128xf32>
    %cst_58 = arith.constant 1.000000e+00 : f32
    %217 = vector.broadcast %cst_58 : f32 to vector<8x128xf32>
    %218 = arith.addf %217, %216 : vector<8x128xf32>
    %219 = arith.divf %217, %218 : vector<8x128xf32>
    %220 = arith.mulf %211, %192 : vector<8x128xf32>
    %221 = arith.mulf %205, %213 : vector<8x128xf32>
    %222 = arith.addf %220, %221 : vector<8x128xf32>
    %223 = math.tanh %222 : vector<8x128xf32>
    %224 = arith.mulf %219, %223 : vector<8x128xf32>
    %c7_i32 = arith.constant 7 : i32
    %225 = arith.index_cast %c7_i32 : i32 to index
    %c0_59 = arith.constant 0 : index
    %c0_60 = arith.constant 0 : index
    %226 = vector.load %arg13[%225, %c0_59, %c0_60] : memref<8x8x512xf32, #tpu.memory_space<vmem>>, vector<1x8x512xf32>
    %227 = vector.shape_cast %226 : vector<1x8x512xf32> to vector<8x512xf32>
    %cst_61 = arith.constant dense<0.000000e+00> : vector<8x512xf32>
    %228 = tpu.matmul %224, %12, %cst_61 {dimension_numbers = #tpu.dot_dimension_numbers<[1], [0], [0], [1], [0, 0, 1, 1], [], []>} : vector<8x128xf32>, vector<128x512xf32>, vector<8x512xf32> -> vector<8x512xf32>
    %229 = arith.addf %227, %228 : vector<8x512xf32>
    %230 = vector.extract_strided_slice %229 {offsets = [0, 0], sizes = [8, 128], strides = [1, 1]} : vector<8x512xf32> to vector<8x128xf32>
    %231 = arith.negf %230 : vector<8x128xf32>
    %232 = math.exp %231 : vector<8x128xf32>
    %cst_62 = arith.constant 1.000000e+00 : f32
    %233 = vector.broadcast %cst_62 : f32 to vector<8x128xf32>
    %234 = arith.addf %233, %232 : vector<8x128xf32>
    %235 = arith.divf %233, %234 : vector<8x128xf32>
    %236 = vector.extract_strided_slice %229 {offsets = [0, 128], sizes = [8, 128], strides = [1, 1]} : vector<8x512xf32> to vector<8x128xf32>
    %237 = arith.negf %236 : vector<8x128xf32>
    %238 = math.exp %237 : vector<8x128xf32>
    %cst_63 = arith.constant 1.000000e+00 : f32
    %239 = vector.broadcast %cst_63 : f32 to vector<8x128xf32>
    %240 = arith.addf %239, %238 : vector<8x128xf32>
    %241 = arith.divf %239, %240 : vector<8x128xf32>
    %242 = vector.extract_strided_slice %229 {offsets = [0, 256], sizes = [8, 128], strides = [1, 1]} : vector<8x512xf32> to vector<8x128xf32>
    %243 = math.tanh %242 : vector<8x128xf32>
    %244 = vector.extract_strided_slice %229 {offsets = [0, 384], sizes = [8, 128], strides = [1, 1]} : vector<8x512xf32> to vector<8x128xf32>
    %245 = arith.negf %244 : vector<8x128xf32>
    %246 = math.exp %245 : vector<8x128xf32>
    %cst_64 = arith.constant 1.000000e+00 : f32
    %247 = vector.broadcast %cst_64 : f32 to vector<8x128xf32>
    %248 = arith.addf %247, %246 : vector<8x128xf32>
    %249 = arith.divf %247, %248 : vector<8x128xf32>
    %250 = arith.mulf %241, %222 : vector<8x128xf32>
    %251 = arith.mulf %235, %243 : vector<8x128xf32>
    %252 = arith.addf %250, %251 : vector<8x128xf32>
    %253 = math.tanh %252 : vector<8x128xf32>
    %254 = arith.mulf %249, %253 : vector<8x128xf32>
    %c8_i32 = arith.constant 8 : i32
    %c0_65 = arith.constant 0 : index
    %c0_66 = arith.constant 0 : index
    %255 = vector.load %arg11[%c0_65, %c0_66] : memref<8x128xf32, #tpu.memory_space<vmem>>, vector<8x128xf32>
    tpu.vector_store %arg11[%c0_65, %c0_66], %254 {strides = array<i32>} : memref<8x128xf32, #tpu.memory_space<vmem>>, vector<8x128xf32>,
    %c0_67 = arith.constant 0 : index
    %c0_68 = arith.constant 0 : index
    %256 = vector.load %arg12[%c0_67, %c0_68] : memref<8x128xf32, #tpu.memory_space<vmem>>, vector<8x128xf32>
    tpu.vector_store %arg12[%c0_67, %c0_68], %252 {strides = array<i32>} : memref<8x128xf32, #tpu.memory_space<vmem>>, vector<8x128xf32>,
    %c0_i32_69 = arith.constant 0 : i32
    %257 = arith.cmpi eq, %arg1, %c0_i32_69 : i32
    %258 = arith.extui %257 : i1 to i32
    %c0_i32_70 = arith.constant 0 : i32
    %259 = arith.cmpi ne, %258, %c0_i32_70 : i32
    scf.if %259 {
      %c0_71 = arith.constant 0 : index
      %c0_72 = arith.constant 0 : index
      %260 = vector.load %arg6[%c0_71, %c0_72] : memref<128x32xf32, #tpu.memory_space<vmem>>, vector<128x32xf32>
      %cst_73 = arith.constant dense<0.000000e+00> : vector<8x32xf32>
      %261 = tpu.matmul %254, %260, %cst_73 {dimension_numbers = #tpu.dot_dimension_numbers<[1], [0], [0], [1], [0, 0, 1, 1], [], []>} : vector<8x128xf32>, vector<128x32xf32>, vector<8x32xf32> -> vector<8x32xf32>
      %c0_74 = arith.constant 0 : index
      %c0_75 = arith.constant 0 : index
      %262 = vector.load %arg7[%c0_74, %c0_75] : memref<1x32xf32, #tpu.memory_space<vmem>>, vector<1x32xf32>
      %263 = vector.broadcast %262 : vector<1x32xf32> to vector<8x32xf32>
      %264 = arith.addf %261, %263 : vector<8x32xf32>
      %c0_76 = arith.constant 0 : index
      %c0_77 = arith.constant 0 : index
      %265 = vector.load %arg8[%c0_76, %c0_77] : memref<32x10xf32, #tpu.memory_space<vmem>>, vector<32x10xf32>
      %cst_78 = arith.constant dense<0.000000e+00> : vector<8x10xf32>
      %266 = tpu.matmul %264, %265, %cst_78 {dimension_numbers = #tpu.dot_dimension_numbers<[1], [0], [0], [1], [0, 0, 1, 1], [], []>} : vector<8x32xf32>, vector<32x10xf32>, vector<8x10xf32> -> vector<8x10xf32>
      %c0_79 = arith.constant 0 : index
      %c0_80 = arith.constant 0 : index
      %267 = vector.load %arg9[%c0_79, %c0_80] : memref<1x10xf32, #tpu.memory_space<vmem>>, vector<1x10xf32>
      %268 = vector.broadcast %267 : vector<1x10xf32> to vector<8x10xf32>
      %269 = arith.addf %266, %268 : vector<8x10xf32>
      %cst_81 = arith.constant dense<0xFF800000> : vector<8xf32>
      %270 = vector.multi_reduction <maximumf>, %269, %cst_81 [1] : vector<8x10xf32> to vector<8xf32>
      %271 = vector.shape_cast %270 : vector<8xf32> to vector<8x1xf32>
      %272 = vector.broadcast %271 : vector<8x1xf32> to vector<8x10xf32>
      %273 = arith.subf %269, %272 : vector<8x10xf32>
      %274 = math.exp %273 : vector<8x10xf32>
      %cst_82 = arith.constant dense<0.000000e+00> : vector<8xf32>
      %275 = vector.multi_reduction <add>, %274, %cst_82 [1] : vector<8x10xf32> to vector<8xf32>
      %276 = vector.shape_cast %275 : vector<8xf32> to vector<8x1xf32>
      %277 = math.log %276 : vector<8x1xf32>
      %278 = vector.broadcast %277 : vector<8x1xf32> to vector<8x10xf32>
      %279 = arith.subf %273, %278 : vector<8x10xf32>
      %c0_83 = arith.constant 0 : index
      %c0_84 = arith.constant 0 : index
      %280 = vector.load %arg10[%c0_83, %c0_84] : memref<8x10xf32, #tpu.memory_space<vmem>>, vector<8x10xf32>
      tpu.vector_store %arg10[%c0_83, %c0_84], %279 {strides = array<i32>} : memref<8x10xf32, #tpu.memory_space<vmem>>, vector<8x10xf32>,
    } else {
    }
    return
  }
  func.func @transform_0(%arg0: i32, %arg1: i32) -> (i32, i32, i32) {
    %c0_i32 = arith.constant 0 : i32
    %c0_i32_0 = arith.constant 0 : i32
    return %arg1, %arg0, %c0_i32 : i32, i32, i32
  }
  func.func @transform_1(%arg0: i32, %arg1: i32) -> (i32, i32) {
    %c0_i32 = arith.constant 0 : i32
    %c0_i32_0 = arith.constant 0 : i32
    %c0_i32_1 = arith.constant 0 : i32
    return %c0_i32, %c0_i32_0 : i32, i32
  }
  func.func @transform_2(%arg0: i32, %arg1: i32) -> (i32, i32) {
    %c0_i32 = arith.constant 0 : i32
    %c0_i32_0 = arith.constant 0 : i32
    %c0_i32_1 = arith.constant 0 : i32
    return %c0_i32, %c0_i32_0 : i32, i32
  }
  func.func @transform_3(%arg0: i32, %arg1: i32) -> (i32, i32) {
    %c0_i32 = arith.constant 0 : i32
    %c0_i32_0 = arith.constant 0 : i32
    %c0_i32_1 = arith.constant 0 : i32
    return %c0_i32, %c0_i32_0 : i32, i32
  }
  func.func @transform_4(%arg0: i32, %arg1: i32) -> (i32, i32) {
    %c0_i32 = arith.constant 0 : i32
    %c0_i32_0 = arith.constant 0 : i32
    %c0_i32_1 = arith.constant 0 : i32
    return %c0_i32, %c0_i32_0 : i32, i32
  }
  func.func @transform_5(%arg0: i32, %arg1: i32) -> (i32, i32) {
    %c0_i32 = arith.constant 0 : i32
    %c0_i32_0 = arith.constant 0 : i32
    %c0_i32_1 = arith.constant 0 : i32
    return %c0_i32, %c0_i32_0 : i32, i32
  }
  func.func @transform_6(%arg0: i32, %arg1: i32) -> (i32, i32) {
    %c0_i32 = arith.constant 0 : i32
    %c0_i32_0 = arith.constant 0 : i32
    %c0_i32_1 = arith.constant 0 : i32
    return %c0_i32, %c0_i32_0 : i32, i32
  }
  func.func @transform_7(%arg0: i32, %arg1: i32) -> (i32, i32) {
    %c0_i32 = arith.constant 0 : i32
    %c0_i32_0 = arith.constant 0 : i32
    %c0_i32_1 = arith.constant 0 : i32
    return %c0_i32, %c0_i32_0 : i32, i32
  }
  func.func @transform_8(%arg0: i32, %arg1: i32) -> (i32, i32) {
    %c0_i32 = arith.constant 0 : i32
    %c0_i32_0 = arith.constant 0 : i32
    return %arg0, %c0_i32 : i32, i32
  }
}

</mosaic_0001>

<bundles_post_ra>
// kernel: rnn_forward.1
= control target key start
LH: loop header
LB: loop body
LE: loop exit
PB: predicated region body
PF: predicated region fallthrough
CT: control target
= control target key end

     0   :  { %vm3621_vm0 = vmmov 0   ;;  %vm2403_vm1 = vcmask 261120   ;;  %vm2477_vm2 = vcmask 80896   ;;  %s5206_s1 = inlined_call_operand.vmem [shape: f32[512,512], index: 1, kind: input, shape index: {}]   ;;  %s5207_s0 = inlined_call_operand.vmem [shape: f32[8,8,512], index: 0, kind: input, shape index: {}]   ;;  %s5208_s2 = inlined_call_operand.vmem [shape: f32[128,512], index: 2, kind: input, shape index: {}]   ;;  %s5209_s3 = inlined_call_operand.vmem [shape: f32[1,512], index: 3, kind: input, shape index: {}]   ;;  %s5210_s4 = inlined_call_operand.vmem [shape: f32[128,32], index: 4, kind: input, shape index: {}]   ;;  %s5211_s6 = inlined_call_operand.vmem [shape: f32[32,10], index: 6, kind: input, shape index: {}]   ;;  %s5212_s5 = inlined_call_operand.vmem [shape: f32[1,32], index: 5, kind: input, shape index: {}]   ;;  %s5213_s7 = inlined_call_operand.vmem [shape: f32[1,10], index: 7, kind: input, shape index: {}]   ;;  %s5214_s8 = inlined_call_operand.vmem [shape: f32[8,10], index: 8, kind: output, shape index: {}]  }
   0x1   :  { %v68_v0 = vld [vmem:[%s5206_s1 + $0x8] sm:$0xff]  ;;  %v70_v2 = vld [vmem:[%s5206_s1 + $0x18] sm:$0xff]  ;;  %v67_v5 = vld [vmem:[%s5206_s1] sm:$0xff] }
   0x2   :  { %v72_v1 = vld [vmem:[%s5206_s1 + $0x28] sm:$0xff]  ;;  %v74_v4 = vld [vmem:[%s5206_s1 + $0x38] sm:$0xff]  ;;  %v71_v6 = vld [vmem:[%s5206_s1 + $0x20] sm:$0xff] }
   0x3   :  { %v2590_v3 = vpack.c.bf16 %v72_v1, %v68_v0  ;;  %v2718_v7 = vpack.c.bf16 %v74_v4, %v70_v2  ;;  %v2592_v8 = vpack.c.bf16 %v71_v6, %v67_v5  ;;  %v69_v9 = vld [vmem:[%s5206_s1 + $0x10] sm:$0xff]  ;;  %v76_v11 = vld [vmem:[%s5206_s1 + $0x48] sm:$0xff]  ;;  %v78_v14 = vld [vmem:[%s5206_s1 + $0x58] sm:$0xff] }
   0x4   :  { %v73_v10 = vld [vmem:[%s5206_s1 + $0x30] sm:$0xff]  ;;  %v80_v13 = vld [vmem:[%s5206_s1 + $0x68] sm:$0xff]  ;;  %v82_v15 = vld [vmem:[%s5206_s1 + $0x78] sm:$0xff] }
   0x5   :  { %2591 = vmatprep.subr.bf16.mxu0 %v2590_v3  ;;  %v2720_v12 = vpack.c.bf16 %v73_v10, %v69_v9  ;;  %2719 = vmatprep.subr.bf16.mxu1 %v2718_v7  ;;  %v2594_v16 = vpack.c.bf16 %v80_v13, %v76_v11  ;;  %v2722_v17 = vpack.c.bf16 %v82_v15, %v78_v14  ;;  %v75_v18 = vld [vmem:[%s5206_s1 + $0x40] sm:$0xff]  ;;  %v77_v20 = vld [vmem:[%s5206_s1 + $0x50] sm:$0xff]  ;;  %v84_v23 = vld [vmem:[%s5206_s1 + $0x88] sm:$0xff] }
   0x6   :  { %2593 = vmatpush1.bf16.msra.mxu0 %v2592_v8  ;;  %v79_v19 = vld [vmem:[%s5206_s1 + $0x60] sm:$0xff]  ;;  %v81_v22 = vld [vmem:[%s5206_s1 + $0x70] sm:$0xff]  ;;  %v88_v24 = vld [vmem:[%s5206_s1 + $0xa8] sm:$0xff] }
   0x7   :  { %2721 = vmatpush1.bf16.msra.mxu1 %v2720_v12  ;;  %v2596_v21 = vpack.c.bf16 %v79_v19, %v75_v18  ;;  %2595 = vmatprep.subr.bf16.mxu0 %v2594_v16  ;;  %v2724_v25 = vpack.c.bf16 %v81_v22, %v77_v20  ;;  %v2598_v26 = vpack.c.bf16 %v88_v24, %v84_v23  ;;  %v86_v27 = vld [vmem:[%s5206_s1 + $0x98] sm:$0xff]  ;;  %v83_v29 = vld [vmem:[%s5206_s1 + $0x80] sm:$0xff]  ;;  %v85_v32 = vld [vmem:[%s5206_s1 + $0x90] sm:$0xff] }
   0x8   :  { %2723 = vmatprep.subr.bf16.mxu1 %v2722_v17  ;;  %v90_v28 = vld [vmem:[%s5206_s1 + $0xb8] sm:$0xff]  ;;  %v87_v31 = vld [vmem:[%s5206_s1 + $0xa0] sm:$0xff]  ;;  %v89_v33 = vld [vmem:[%s5206_s1 + $0xb0] sm:$0xff] }
   0x9   :  { %v2726_v30 = vpack.c.bf16 %v90_v28, %v86_v27  ;;  %v2600_v34 = vpack.c.bf16 %v87_v31, %v83_v29  ;;  %v92_v35 = vld [vmem:[%s5206_s1 + $0xc8] sm:$0xff]  ;;  %v94_v37 = vld [vmem:[%s5206_s1 + $0xd8] sm:$0xff]  ;;  %v2728_v38 = vpack.c.bf16 %v89_v33, %v85_v32  ;;  %v91_v41 = vld [vmem:[%s5206_s1 + $0xc0] sm:$0xff] }
   0xa   :  { %2597 = vmatpush1.bf16.msra.mxu0 %v2596_v21  ;;  %v96_v36 = vld [vmem:[%s5206_s1 + $0xe8] sm:$0xff]  ;;  %v98_v40 = vld [vmem:[%s5206_s1 + $0xf8] sm:$0xff]  ;;  %v95_v42 = vld [vmem:[%s5206_s1 + $0xe0] sm:$0xff] }
   0xb   :  { %2725 = vmatpush1.bf16.msra.mxu1 %v2724_v25  ;;  %2599 = vmatprep.subr.bf16.mxu0 %v2598_v26  ;;  %v2602_v39 = vpack.c.bf16 %v96_v36, %v92_v35  ;;  %v2730_v43 = vpack.c.bf16 %v98_v40, %v94_v37  ;;  %v93_v44 = vld [vmem:[%s5206_s1 + $0xd0] sm:$0xff]  ;;  %v100_v46 = vld [vmem:[%s5206_s1 + $0x108] sm:$0xff]  ;;  %v102_v48 = vld [vmem:[%s5206_s1 + $0x118] sm:$0xff]  ;;  %v2604_v50 = vpack.c.bf16 %v95_v42, %v91_v41 }
   0xc   :  { %2727 = vmatprep.subr.bf16.mxu1 %v2726_v30  ;;  %v97_v45 = vld [vmem:[%s5206_s1 + $0xf0] sm:$0xff]  ;;  %v104_v47 = vld [vmem:[%s5206_s1 + $0x128] sm:$0xff]  ;;  %v106_v49 = vld [vmem:[%s5206_s1 + $0x138] sm:$0xff] }
   0xd   :  { %v2732_v51 = vpack.c.bf16 %v97_v45, %v93_v44  ;;  %v2606_v52 = vpack.c.bf16 %v104_v47, %v100_v46  ;;  %v99_v53 = vld [vmem:[%s5206_s1 + $0x100] sm:$0xff]  ;;  %v101_v55 = vld [vmem:[%s5206_s1 + $0x110] sm:$0xff]  ;;  %v2734_v56 = vpack.c.bf16 %v106_v49, %v102_v48  ;;  %v108_v58 = vld [vmem:[%s5206_s1 + $0x148] sm:$0xff] }
   0xe   :  { %2601 = vmatpush1.bf16.msra.mxu0 %v2600_v34  ;;  %v103_v54 = vld [vmem:[%s5206_s1 + $0x120] sm:$0xff]  ;;  %v105_v57 = vld [vmem:[%s5206_s1 + $0x130] sm:$0xff]  ;;  %v112_v59 = vld [vmem:[%s5206_s1 + $0x168] sm:$0xff] }
   0xf   :  { %2729 = vmatpush1.bf16.msra.mxu1 %v2728_v38  ;;  %2603 = vmatprep.subr.bf16.mxu0 %v2602_v39  ;;  %v110_v60 = vld [vmem:[%s5206_s1 + $0x158] sm:$0xff]  ;;  %v2608_v62 = vpack.c.bf16 %v103_v54, %v99_v53  ;;  %v2736_v63 = vpack.c.bf16 %v105_v57, %v101_v55  ;;  %v2610_v0 = vpack.c.bf16 %v112_v59, %v108_v58  ;;  %v107_v1 = vld [vmem:[%s5206_s1 + $0x140] sm:$0xff]  ;;  %v109_v3 = vld [vmem:[%s5206_s1 + $0x150] sm:$0xff] }
  0x10   :  { %2731 = vmatprep.subr.bf16.mxu1 %v2730_v43  ;;  %v114_v61 = vld [vmem:[%s5206_s1 + $0x178] sm:$0xff]  ;;  %v111_v2 = vld [vmem:[%s5206_s1 + $0x160] sm:$0xff]  ;;  %v113_v5 = vld [vmem:[%s5206_s1 + $0x170] sm:$0xff] }
  0x11   :  { %v2738_v4 = vpack.c.bf16 %v114_v61, %v110_v60  ;;  %v116_v6 = vld [vmem:[%s5206_s1 + $0x188] sm:$0xff]  ;;  %v118_v8 = vld [vmem:[%s5206_s1 + $0x198] sm:$0xff]  ;;  %v2612_v10 = vpack.c.bf16 %v111_v2, %v107_v1  ;;  %v2740_v11 = vpack.c.bf16 %v113_v5, %v109_v3  ;;  %v115_v13 = vld [vmem:[%s5206_s1 + $0x180] sm:$0xff] }
  0x12   :  { %2605 = vmatpush1.bf16.msra.mxu0 %v2604_v50  ;;  %v120_v7 = vld [vmem:[%s5206_s1 + $0x1a8] sm:$0xff]  ;;  %v122_v9 = vld [vmem:[%s5206_s1 + $0x1b8] sm:$0xff]  ;;  %v119_v14 = vld [vmem:[%s5206_s1 + $0x1a0] sm:$0xff] }
  0x13   :  { %2733 = vmatpush1.bf16.msra.mxu1 %v2732_v51  ;;  %2607 = vmatprep.subr.bf16.mxu0 %v2606_v52  ;;  %v2614_v12 = vpack.c.bf16 %v120_v7, %v116_v6  ;;  %v117_v15 = vld [vmem:[%s5206_s1 + $0x190] sm:$0xff]  ;;  %v2742_v16 = vpack.c.bf16 %v122_v9, %v118_v8  ;;  %v124_v18 = vld [vmem:[%s5206_s1 + $0x1c8] sm:$0xff]  ;;  %v126_v20 = vld [vmem:[%s5206_s1 + $0x1d8] sm:$0xff]  ;;  %v2616_v22 = vpack.c.bf16 %v119_v14, %v115_v13 }
  0x14   :  { %2735 = vmatprep.subr.bf16.mxu1 %v2734_v56  ;;  %v121_v17 = vld [vmem:[%s5206_s1 + $0x1b0] sm:$0xff]  ;;  %v128_v19 = vld [vmem:[%s5206_s1 + $0x1e8] sm:$0xff]  ;;  %v130_v21 = vld [vmem:[%s5206_s1 + $0x1f8] sm:$0xff] }
  0x15   :  { %v2744_v23 = vpack.c.bf16 %v121_v17, %v117_v15  ;;  %v2618_v24 = vpack.c.bf16 %v128_v19, %v124_v18  ;;  %v123_v25 = vld [vmem:[%s5206_s1 + $0x1c0] sm:$0xff]  ;;  %v125_v27 = vld [vmem:[%s5206_s1 + $0x1d0] sm:$0xff]  ;;  %v2746_v28 = vpack.c.bf16 %v130_v21, %v126_v20  ;;  %v132_v30 = vld [vmem:[%s5206_s1 + $0x208] sm:$0xff] }
  0x16   :  { %2609 = vmatpush1.bf16.msra.mxu0 %v2608_v62  ;;  %v127_v26 = vld [vmem:[%s5206_s1 + $0x1e0] sm:$0xff]  ;;  %v129_v29 = vld [vmem:[%s5206_s1 + $0x1f0] sm:$0xff]  ;;  %v136_v31 = vld [vmem:[%s5206_s1 + $0x228] sm:$0xff] }
  0x17   :  { %2737 = vmatpush1.bf16.msra.mxu1 %v2736_v63  ;;  %2611 = vmatprep.subr.bf16.mxu0 %v2610_v0  ;;  %v134_v32 = vld [vmem:[%s5206_s1 + $0x218] sm:$0xff]  ;;  %v2620_v34 = vpack.c.bf16 %v127_v26, %v123_v25  ;;  %v2748_v35 = vpack.c.bf16 %v129_v29, %v125_v27  ;;  %v2622_v36 = vpack.c.bf16 %v136_v31, %v132_v30  ;;  %v131_v37 = vld [vmem:[%s5206_s1 + $0x200] sm:$0xff]  ;;  %v133_v39 = vld [vmem:[%s5206_s1 + $0x210] sm:$0xff] }
  0x18   :  { %2739 = vmatprep.subr.bf16.mxu1 %v2738_v4  ;;  %v138_v33 = vld [vmem:[%s5206_s1 + $0x238] sm:$0xff]  ;;  %v135_v38 = vld [vmem:[%s5206_s1 + $0x220] sm:$0xff]  ;;  %v137_v41 = vld [vmem:[%s5206_s1 + $0x230] sm:$0xff] }
  0x19   :  { %v2750_v40 = vpack.c.bf16 %v138_v33, %v134_v32  ;;  %v140_v42 = vld [vmem:[%s5206_s1 + $0x248] sm:$0xff]  ;;  %v142_v44 = vld [vmem:[%s5206_s1 + $0x258] sm:$0xff]  ;;  %v2624_v46 = vpack.c.bf16 %v135_v38, %v131_v37  ;;  %v2752_v47 = vpack.c.bf16 %v137_v41, %v133_v39  ;;  %v139_v49 = vld [vmem:[%s5206_s1 + $0x240] sm:$0xff] }
  0x1a   :  { %2613 = vmatpush1.bf16.msra.mxu0 %v2612_v10  ;;  %v144_v43 = vld [vmem:[%s5206_s1 + $0x268] sm:$0xff]  ;;  %v146_v45 = vld [vmem:[%s5206_s1 + $0x278] sm:$0xff]  ;;  %v143_v50 = vld [vmem:[%s5206_s1 + $0x260] sm:$0xff] }
  0x1b   :  { %2741 = vmatpush1.bf16.msra.mxu1 %v2740_v11  ;;  %2615 = vmatprep.subr.bf16.mxu0 %v2614_v12  ;;  %v2626_v48 = vpack.c.bf16 %v144_v43, %v140_v42  ;;  %v141_v51 = vld [vmem:[%s5206_s1 + $0x250] sm:$0xff]  ;;  %v2754_v52 = vpack.c.bf16 %v146_v45, %v142_v44  ;;  %v148_v54 = vld [vmem:[%s5206_s1 + $0x288] sm:$0xff]  ;;  %v150_v56 = vld [vmem:[%s5206_s1 + $0x298] sm:$0xff]  ;;  %v2628_v58 = vpack.c.bf16 %v143_v50, %v139_v49 }
  0x1c   :  { %2743 = vmatprep.subr.bf16.mxu1 %v2742_v16  ;;  %v145_v53 = vld [vmem:[%s5206_s1 + $0x270] sm:$0xff]  ;;  %v152_v55 = vld [vmem:[%s5206_s1 + $0x2a8] sm:$0xff]  ;;  %v154_v57 = vld [vmem:[%s5206_s1 + $0x2b8] sm:$0xff] }
  0x1d   :  { %v2756_v59 = vpack.c.bf16 %v145_v53, %v141_v51  ;;  %v2630_v60 = vpack.c.bf16 %v152_v55, %v148_v54  ;;  %v147_v61 = vld [vmem:[%s5206_s1 + $0x280] sm:$0xff]  ;;  %v149_v63 = vld [vmem:[%s5206_s1 + $0x290] sm:$0xff]  ;;  %v2758_v0 = vpack.c.bf16 %v154_v57, %v150_v56  ;;  %v156_v2 = vld [vmem:[%s5206_s1 + $0x2c8] sm:$0xff] }
  0x1e   :  { %2617 = vmatpush1.bf16.msra.mxu0 %v2616_v22  ;;  %v151_v62 = vld [vmem:[%s5206_s1 + $0x2a0] sm:$0xff]  ;;  %v153_v1 = vld [vmem:[%s5206_s1 + $0x2b0] sm:$0xff]  ;;  %v160_v3 = vld [vmem:[%s5206_s1 + $0x2e8] sm:$0xff] }
  0x1f   :  { %2745 = vmatpush1.bf16.msra.mxu1 %v2744_v23  ;;  %2619 = vmatprep.subr.bf16.mxu0 %v2618_v24  ;;  %v158_v4 = vld [vmem:[%s5206_s1 + $0x2d8] sm:$0xff]  ;;  %v2632_v6 = vpack.c.bf16 %v151_v62, %v147_v61  ;;  %v155_v7 = vld [vmem:[%s5206_s1 + $0x2c0] sm:$0xff]  ;;  %v2760_v8 = vpack.c.bf16 %v153_v1, %v149_v63  ;;  %v2634_v9 = vpack.c.bf16 %v160_v3, %v156_v2  ;;  %v157_v11 = vld [vmem:[%s5206_s1 + $0x2d0] sm:$0xff] }
  0x20   :  { %2747 = vmatprep.subr.bf16.mxu1 %v2746_v28  ;;  %v162_v5 = vld [vmem:[%s5206_s1 + $0x2f8] sm:$0xff]  ;;  %v159_v10 = vld [vmem:[%s5206_s1 + $0x2e0] sm:$0xff]  ;;  %v161_v12 = vld [vmem:[%s5206_s1 + $0x2f0] sm:$0xff] }
  0x21   :  { %v2762_v13 = vpack.c.bf16 %v162_v5, %v158_v4  ;;  %v164_v14 = vld [vmem:[%s5206_s1 + $0x308] sm:$0xff]  ;;  %v166_v17 = vld [vmem:[%s5206_s1 + $0x318] sm:$0xff]  ;;  %v2636_v19 = vpack.c.bf16 %v159_v10, %v155_v7  ;;  %v2764_v20 = vpack.c.bf16 %v161_v12, %v157_v11  ;;  %v163_v22 = vld [vmem:[%s5206_s1 + $0x300] sm:$0xff] }
  0x22   :  { %2621 = vmatpush1.bf16.msra.mxu0 %v2620_v34  ;;  %v168_v15 = vld [vmem:[%s5206_s1 + $0x328] sm:$0xff]  ;;  %v170_v18 = vld [vmem:[%s5206_s1 + $0x338] sm:$0xff]  ;;  %v167_v23 = vld [vmem:[%s5206_s1 + $0x320] sm:$0xff] }
  0x23   :  { %2749 = vmatpush1.bf16.msra.mxu1 %v2748_v35  ;;  %2623 = vmatprep.subr.bf16.mxu0 %v2622_v36  ;;  %v36_v16 = vld [vmem:[%s5207_s0 + $0x8] sm:$0xff]  ;;  %v2638_v21 = vpack.c.bf16 %v168_v15, %v164_v14  ;;  %v165_v24 = vld [vmem:[%s5206_s1 + $0x310] sm:$0xff]  ;;  %v2766_v25 = vpack.c.bf16 %v170_v18, %v166_v17  ;;  %v174_v29 = vld [vmem:[%s5206_s1 + $0x358] sm:$0xff]  ;;  %v2640_v31 = vpack.c.bf16 %v167_v23, %v163_v22 }
  0x24   :  { %2751 = vmatprep.subr.bf16.mxu1 %v2750_v40  ;;  %409 = vmatprep.mubr.f32.mxu0 %v36_v16  ;;  %v169_v26 = vld [vmem:[%s5206_s1 + $0x330] sm:$0xff]  ;;  %v172_v27 = vld [vmem:[%s5206_s1 + $0x348] sm:$0xff]  ;;  %v178_v30 = vld [vmem:[%s5206_s1 + $0x378] sm:$0xff] }
  0x25   :  { %635 = vmatprep.mubr.f32.mxu1 %v36_v16  ;;  %v176_v28 = vld [vmem:[%s5206_s1 + $0x368] sm:$0xff]  ;;  %v2768_v32 = vpack.c.bf16 %v169_v26, %v165_v24  ;;  %v171_v34 = vld [vmem:[%s5206_s1 + $0x340] sm:$0xff]  ;;  %v173_v36 = vld [vmem:[%s5206_s1 + $0x350] sm:$0xff]  ;;  %v2770_v37 = vpack.c.bf16 %v178_v30, %v174_v29 }
  0x26   :  { %2625 = vmatpush1.bf16.msra.mxu0 %v2624_v46  ;;  %v2642_v33 = vpack.c.bf16 %v176_v28, %v172_v27  ;;  %v175_v35 = vld [vmem:[%s5206_s1 + $0x360] sm:$0xff]  ;;  %v177_v38 = vld [vmem:[%s5206_s1 + $0x370] sm:$0xff]  ;;  %v180_v39 = vld [vmem:[%s5206_s1 + $0x388] sm:$0xff] }
  0x27   :  { %2753 = vmatpush1.bf16.msra.mxu1 %v2752_v47  ;;  %2627 = vmatprep.subr.bf16.mxu0 %v2626_v48  ;;  %v184_v40 = vld [vmem:[%s5206_s1 + $0x3a8] sm:$0xff]  ;;  %v182_v41 = vld [vmem:[%s5206_s1 + $0x398] sm:$0xff]  ;;  %v2644_v43 = vpack.c.bf16 %v175_v35, %v171_v34  ;;  %v2772_v44 = vpack.c.bf16 %v177_v38, %v173_v36  ;;  %v179_v46 = vld [vmem:[%s5206_s1 + $0x380] sm:$0xff] }
  0x28   :  { %2755 = vmatprep.subr.bf16.mxu1 %v2754_v52  ;;  %v186_v42 = vld [vmem:[%s5206_s1 + $0x3b8] sm:$0xff]  ;;  %v2646_v45 = vpack.c.bf16 %v184_v40, %v180_v39  ;;  %v183_v47 = vld [vmem:[%s5206_s1 + $0x3a0] sm:$0xff]  ;;  %v181_v48 = vld [vmem:[%s5206_s1 + $0x390] sm:$0xff] }
  0x29   :  { %v2774_v49 = vpack.c.bf16 %v186_v42, %v182_v41  ;;  %v185_v50 = vld [vmem:[%s5206_s1 + $0x3b0] sm:$0xff]  ;;  %v188_v51 = vld [vmem:[%s5206_s1 + $0x3c8] sm:$0xff]  ;;  %v190_v53 = vld [vmem:[%s5206_s1 + $0x3d8] sm:$0xff]  ;;  %v2648_v55 = vpack.c.bf16 %v183_v47, %v179_v46 }
  0x2a   :  { %2629 = vmatpush1.bf16.msra.mxu0 %v2628_v58  ;;  %v192_v52 = vld [vmem:[%s5206_s1 + $0x3e8] sm:$0xff]  ;;  %v194_v54 = vld [vmem:[%s5206_s1 + $0x3f8] sm:$0xff]  ;;  %v2776_v56 = vpack.c.bf16 %v185_v50, %v181_v48  ;;  %v187_v58 = vld [vmem:[%s5206_s1 + $0x3c0] sm:$0xff] }
  0x2b   :  { %2757 = vmatpush1.bf16.msra.mxu1 %v2756_v59  ;;  %2631 = vmatprep.subr.bf16.mxu0 %v2630_v60  ;;  %v2650_v57 = vpack.c.bf16 %v192_v52, %v188_v51  ;;  %v191_v59 = vld [vmem:[%s5206_s1 + $0x3e0] sm:$0xff]  ;;  %v189_v60 = vld [vmem:[%s5206_s1 + $0x3d0] sm:$0xff]  ;;  %v2778_v61 = vpack.c.bf16 %v194_v54, %v190_v53  ;;  %v196_v63 = vld [vmem:[%s5206_s1 + $0x408] sm:$0xff] }
  0x2c   :  { %2759 = vmatprep.subr.bf16.mxu1 %v2758_v0  ;;  %v193_v62 = vld [vmem:[%s5206_s1 + $0x3f0] sm:$0xff]  ;;  %v200_v0 = vld [vmem:[%s5206_s1 + $0x428] sm:$0xff]  ;;  %v198_v1 = vld [vmem:[%s5206_s1 + $0x418] sm:$0xff]  ;;  %v2652_v3 = vpack.c.bf16 %v191_v59, %v187_v58 }
  0x2d   :  { %v202_v2 = vld [vmem:[%s5206_s1 + $0x438] sm:$0xff]  ;;  %v2780_v4 = vpack.c.bf16 %v193_v62, %v189_v60  ;;  %v2654_v5 = vpack.c.bf16 %v200_v0, %v196_v63  ;;  %v199_v7 = vld [vmem:[%s5206_s1 + $0x420] sm:$0xff]  ;;  %v201_v10 = vld [vmem:[%s5206_s1 + $0x430] sm:$0xff] }
  0x2e   :  { %2633 = vmatpush1.bf16.msra.mxu0 %v2632_v6  ;;  %v195_v6 = vld [vmem:[%s5206_s1 + $0x400] sm:$0xff]  ;;  %v204_v11 = vld [vmem:[%s5206_s1 + $0x448] sm:$0xff]  ;;  %v210_v14 = vld [vmem:[%s5206_s1 + $0x478] sm:$0xff] }
  0x2f   :  { %2761 = vmatpush1.bf16.msra.mxu1 %v2760_v8  ;;  %2635 = vmatprep.subr.bf16.mxu0 %v2634_v9  ;;  %v197_v8 = vld [vmem:[%s5206_s1 + $0x410] sm:$0xff]  ;;  %v2782_v9 = vpack.c.bf16 %v202_v2, %v198_v1  ;;  %v208_v12 = vld [vmem:[%s5206_s1 + $0x468] sm:$0xff]  ;;  %v35_v15 = vld [vmem:[%s5207_s0] sm:$0xff]  ;;  %v2656_v16 = vpack.c.bf16 %v199_v7, %v195_v6 }
  0x30   :  { %2763 = vmatprep.subr.bf16.mxu1 %v2762_v13  ;;  %v206_v13 = vld [vmem:[%s5206_s1 + $0x458] sm:$0xff]  ;;  %v2784_v17 = vpack.c.bf16 %v201_v10, %v197_v8  ;;  %v2658_v18 = vpack.c.bf16 %v208_v12, %v204_v11  ;;  %v209_v23 = vld [vmem:[%s5206_s1 + $0x470] sm:$0xff]  ;;  %v212_v24 = vld [vmem:[%s5206_s1 + $0x488] sm:$0xff] }
  0x31   :  { %v2786_v22 = vpack.c.bf16 %v210_v14, %v206_v13  ;;  %v214_v26 = vld [vmem:[%s5206_s1 + $0x498] sm:$0xff]  ;;  %v40_v28 = vld [vmem:[%s5207_s0 + $0x28] sm:$0xff]  ;;  %v39_v30 = vld [vmem:[%s5207_s0 + $0x20] sm:$0xff] }
  0x32   :  { %2637 = vmatpush1.bf16.msra.mxu0 %v2636_v19  ;;  %v203_v19 = vld [vmem:[%s5206_s1 + $0x440] sm:$0xff]  ;;  %v218_v27 = vld [vmem:[%s5206_s1 + $0x4b8] sm:$0xff]  ;;  %v213_v35 = vld [vmem:[%s5206_s1 + $0x490] sm:$0xff] }
  0x33   :  { %2765 = vmatpush1.bf16.msra.mxu1 %v2764_v20  ;;  %2639 = vmatprep.subr.bf16.mxu0 %v2638_v21  ;;  %v207_v20 = vld [vmem:[%s5206_s1 + $0x460] sm:$0xff]  ;;  %v205_v21 = vld [vmem:[%s5206_s1 + $0x450] sm:$0xff]  ;;  %v2790_v36 = vpack.c.bf16 %v218_v27, %v214_v26  ;;  %v220_v38 = vld [vmem:[%s5206_s1 + $0x4c8] sm:$0xff] }
  0x34   :  { %2767 = vmatprep.subr.bf16.mxu1 %v2766_v25  ;;  %v216_v25 = vld [vmem:[%s5206_s1 + $0x4a8] sm:$0xff]  ;;  %v2660_v29 = vpack.c.bf16 %v207_v20, %v203_v19  ;;  %v215_v34 = vld [vmem:[%s5206_s1 + $0x4a0] sm:$0xff]  ;;  %v222_v40 = vld [vmem:[%s5206_s1 + $0x4d8] sm:$0xff] }
  0x35   :  { %v224_v39 = vld [vmem:[%s5206_s1 + $0x4e8] sm:$0xff]  ;;  %v226_v41 = vld [vmem:[%s5206_s1 + $0x4f8] sm:$0xff]  ;;  %v219_v47 = vld [vmem:[%s5206_s1 + $0x4c0] sm:$0xff] }
  0x36   :  { %2641 = vmatpush1.bf16.msra.mxu0 %v2640_v31  ;;  %v2788_v31 = vpack.c.bf16 %v209_v23, %v205_v21  ;;  %v44_v42 = vld [vmem:[%s5207_s0 + $0x48] sm:$0xff]  ;;  %v2666_v46 = vpack.c.bf16 %v224_v39, %v220_v38  ;;  %v223_v48 = vld [vmem:[%s5206_s1 + $0x4e0] sm:$0xff]  ;;  %v2794_v50 = vpack.c.bf16 %v226_v41, %v222_v40  ;;  %v225_v51 = vld [vmem:[%s5206_s1 + $0x4f0] sm:$0xff] }
  0x37   :  { %2769 = vmatpush1.bf16.msra.mxu1 %v2768_v32  ;;  %2643 = vmatprep.subr.bf16.mxu0 %v2642_v33  ;;  %v2662_v32 = vpack.c.bf16 %v216_v25, %v212_v24  ;;  %v211_v33 = vld [vmem:[%s5206_s1 + $0x480] sm:$0xff]  ;;  %v228_v52 = vld [vmem:[%s5206_s1 + $0x508] sm:$0xff]  ;;  %v230_v54 = vld [vmem:[%s5206_s1 + $0x518] sm:$0xff] }
  0x38   :  { %2771 = vmatprep.subr.bf16.mxu1 %v2770_v37  ;;  %v217_v37 = vld [vmem:[%s5206_s1 + $0x4b0] sm:$0xff]  ;;  %v232_v53 = vld [vmem:[%s5206_s1 + $0x528] sm:$0xff]  ;;  %v47_v58 = vld [vmem:[%s5207_s0 + $0x60] sm:$0xff] }
  0x39   :  { %v2670_v60 = vpack.c.bf16 %v232_v53, %v228_v52  ;;  %v231_v62 = vld [vmem:[%s5206_s1 + $0x520] sm:$0xff]  ;;  %v229_v63 = vld [vmem:[%s5206_s1 + $0x510] sm:$0xff]  ;;  %v236_v2 = vld [vmem:[%s5206_s1 + $0x548] sm:$0xff] }
  0x3a   :  { %2645 = vmatpush1.bf16.msra.mxu0 %v2644_v43  ;;  %v2664_v43 = vpack.c.bf16 %v215_v34, %v211_v33  ;;  %v233_v1 = vld [vmem:[%s5206_s1 + $0x530] sm:$0xff]  ;;  %v52_v6 = vld [vmem:[%s5207_s0 + $0x88] sm:$0xff]  ;;  %v51_v8 = vld [vmem:[%s5207_s0 + $0x80] sm:$0xff] }
  0x3b   :  { %2773 = vmatpush1.bf16.msra.mxu1 %v2772_v44  ;;  %2647 = vmatprep.subr.bf16.mxu0 %v2646_v45  ;;  %v43_v44 = vld [vmem:[%s5207_s0 + $0x40] sm:$0xff]  ;;  %v2792_v45 = vpack.c.bf16 %v217_v37, %v213_v35  ;;  %v237_v13 = vld [vmem:[%s5206_s1 + $0x550] sm:$0xff]  ;;  %v250_v19 = vld [vmem:[%s5206_s1 + $0x5b8] sm:$0xff] }
  0x3c   :  { %2775 = vmatprep.subr.bf16.mxu1 %v2774_v49  ;;  %v221_v49 = vld [vmem:[%s5206_s1 + $0x4d0] sm:$0xff]  ;;  %v235_v11 = vld [vmem:[%s5206_s1 + $0x540] sm:$0xff]  ;;  %v56_v20 = vld [vmem:[%s5207_s0 + $0xa8] sm:$0xff] }
  0x3d   :  { %v2796_v59 = vpack.c.bf16 %v225_v51, %v221_v49  ;;  %v239_v12 = vld [vmem:[%s5206_s1 + $0x560] sm:$0xff]  ;;  %v245_v27 = vld [vmem:[%s5206_s1 + $0x590] sm:$0xff]  ;;  %v258_v33 = vld [vmem:[%s5206_s1 + $0x5f8] sm:$0xff] }
  0x3e   :  { %2649 = vmatpush1.bf16.msra.mxu0 %v2648_v55  ;;  %v234_v55 = vld [vmem:[%s5206_s1 + $0x538] sm:$0xff]  ;;  %v2676_v21 = vpack.c.bf16 %v239_v12, %v235_v11  ;;  %v243_v25 = vld [vmem:[%s5206_s1 + $0x580] sm:$0xff]  ;;  %v60_v34 = vld [vmem:[%s5207_s0 + $0xc8] sm:$0xff] }
  0x3f   :  { %2777 = vmatpush1.bf16.msra.mxu1 %v2776_v56  ;;  %2651 = vmatprep.subr.bf16.mxu0 %v2650_v57  ;;  %v48_v56 = vld [vmem:[%s5207_s0 + $0x68] sm:$0xff]  ;;  %v2668_v57 = vpack.c.bf16 %v223_v48, %v219_v47  ;;  %v2798_v0 = vpack.c.bf16 %v234_v55, %v230_v54  ;;  %v247_v26 = vld [vmem:[%s5206_s1 + $0x5a0] sm:$0xff]  ;;  %v253_v41 = vld [vmem:[%s5206_s1 + $0x5d0] sm:$0xff] }
  0x40   :  { %2779 = vmatprep.subr.bf16.mxu1 %v2778_v61  ;;  %v227_v61 = vld [vmem:[%s5206_s1 + $0x500] sm:$0xff]  ;;  %v2680_v35 = vpack.c.bf16 %v247_v26, %v243_v25  ;;  %v266_v47 = vld [vmem:[%s5206_s1 + $0x638] sm:$0xff]  ;;  %v64_v48 = vld [vmem:[%s5207_s0 + $0xe8] sm:$0xff] }
  0x41   :  { %v2672_v7 = vpack.c.bf16 %v231_v62, %v227_v61  ;;  %v251_v39 = vld [vmem:[%s5206_s1 + $0x5c0] sm:$0xff]  ;;  %v261_v55 = vld [vmem:[%s5206_s1 + $0x610] sm:$0xff]  ;;  %v274_v61 = vld [vmem:[%s5206_s1 + $0x678] sm:$0xff] }
  0x42   :  { %2653 = vmatpush1.bf16.msra.mxu0 %v2652_v3  ;;  %v240_v3 = vld [vmem:[%s5206_s1 + $0x568] sm:$0xff]  ;;  %v255_v40 = vld [vmem:[%s5206_s1 + $0x5e0] sm:$0xff]  ;;  %v38_v62 = vld [vmem:[%s5207_s0 + $0x18] sm:$0xff] }
  0x43   :  { %2781 = vmatpush1.bf16.msra.mxu1 %v2780_v4  ;;  %2655 = vmatprep.subr.bf16.mxu0 %v2654_v5  ;;  %v238_v4 = vld [vmem:[%s5206_s1 + $0x558] sm:$0xff]  ;;  %v2674_v10 = vpack.c.bf16 %v240_v3, %v236_v2  ;;  %v2684_v49 = vpack.c.bf16 %v255_v40, %v251_v39  ;;  %v259_v53 = vld [vmem:[%s5206_s1 + $0x600] sm:$0xff]  ;;  %v293_v40 = vld [vmem:[%s5206_s1 + $0x710] sm:$0xff] }
  0x44   :  { %2783 = vmatprep.subr.bf16.mxu1 %v2782_v9  ;;  %v242_v5 = vld [vmem:[%s5206_s1 + $0x578] sm:$0xff]  ;;  %v2800_v9 = vpack.c.bf16 %v233_v1, %v229_v63  ;;  %v263_v54 = vld [vmem:[%s5206_s1 + $0x620] sm:$0xff] }
  0x45   :  { %410 = vmatmul.mubr.f32.vlgmr.msra.gmra.mrb[0].mxu0 %v35_v15  ;;  %v2802_v14 = vpack.c.bf16 %v242_v5, %v238_v4  ;;  %v2688_v63 = vpack.c.bf16 %v263_v54, %v259_v53  ;;  %v267_v2 = vld [vmem:[%s5206_s1 + $0x640] sm:$0xff]  ;;  %v269_v4 = vld [vmem:[%s5206_s1 + $0x650] sm:$0xff] }
  0x46   :  { %2657 = vmatpush1.bf16.msra.mxu0 %v2656_v16  ;;  %636 = vmatmul.mubr.f32.vlgmr.msra.gmra.mrb[0].mxu1 %v35_v15  ;;  %v241_v15 = vld [vmem:[%s5206_s1 + $0x570] sm:$0xff]  ;;  %v244_v16 = vld [vmem:[%s5206_s1 + $0x588] sm:$0xff]  ;;  %v271_v3 = vld [vmem:[%s5206_s1 + $0x660] sm:$0xff] }
  0x47   :  { %2785 = vmatpush1.bf16.msra.mxu1 %v2784_v17  ;;  %2659 = vmatprep.subr.bf16.mxu0 %v2658_v18  ;;  %v248_v17 = vld [vmem:[%s5206_s1 + $0x5a8] sm:$0xff]  ;;  %v246_v18 = vld [vmem:[%s5206_s1 + $0x598] sm:$0xff]  ;;  %v2804_v23 = vpack.c.bf16 %v241_v15, %v237_v13  ;;  %v2692_v11 = vpack.c.bf16 %v271_v3, %v267_v2  ;;  %v279_v15 = vld [vmem:[%s5206_s1 + $0x6a0] sm:$0xff] }
  0x48   :  { %2787 = vmatprep.subr.bf16.mxu1 %v2786_v22  ;;  %415 = vmatprep.mubr.f32.mxu0 %v40_v28  ;;  %v55_v22 = vld [vmem:[%s5207_s0 + $0xa0] sm:$0xff]  ;;  %v2678_v24 = vpack.c.bf16 %v248_v17, %v244_v16  ;;  %v277_v16 = vld [vmem:[%s5206_s1 + $0x690] sm:$0xff]  ;;  %v316_v3 = vld [vmem:[%s5206_s1 + $0x7c8] sm:$0xff] }
  0x49   :  { %641 = vmatprep.mubr.f32.mxu1 %v40_v28  ;;  %416 = vmatmul.mubr.f32.gmra.mrb[2].mxu0 %v39_v30  ;;  %v2806_v28 = vpack.c.bf16 %v250_v19, %v246_v18  ;;  %v281_v18 = vld [vmem:[%s5206_s1 + $0x6b0] sm:$0xff]  ;;  %v284_v19 = vld [vmem:[%s5206_s1 + $0x6c8] sm:$0xff]  ;;  %v283_v26 = vld [vmem:[%s5206_s1 + $0x6c0] sm:$0xff] }
  0x4a   :  { %2661 = vmatpush1.bf16.msra.mxu0 %v2660_v29  ;;  %642 = vmatmul.mubr.f32.gmra.mrb[2].mxu1 %v39_v30  ;;  %v249_v29 = vld [vmem:[%s5206_s1 + $0x5b0] sm:$0xff]  ;;  %v252_v30 = vld [vmem:[%s5206_s1 + $0x5c8] sm:$0xff]  ;;  %v295_v39 = vld [vmem:[%s5206_s1 + $0x720] sm:$0xff] }
  0x4b   :  { %2789 = vmatpush1.bf16.msra.mxu1 %v2788_v31  ;;  %2663 = vmatprep.subr.bf16.mxu0 %v2662_v32  ;;  %v256_v31 = vld [vmem:[%s5206_s1 + $0x5e8] sm:$0xff]  ;;  %v254_v32 = vld [vmem:[%s5206_s1 + $0x5d8] sm:$0xff]  ;;  %v2808_v37 = vpack.c.bf16 %v249_v29, %v245_v27  ;;  %v287_v27 = vld [vmem:[%s5206_s1 + $0x6e0] sm:$0xff] }
  0x4c   :  { %2791 = vmatprep.subr.bf16.mxu1 %v2790_v36  ;;  %421 = vmatprep.mubr.f32.mxu0 %v44_v42  ;;  %v59_v36 = vld [vmem:[%s5207_s0 + $0xc0] sm:$0xff]  ;;  %v2682_v38 = vpack.c.bf16 %v256_v31, %v252_v30  ;;  %v289_v30 = vld [vmem:[%s5206_s1 + $0x6f0] sm:$0xff]  ;;  %v292_v31 = vld [vmem:[%s5206_s1 + $0x708] sm:$0xff] }
  0x4d   :  { %647 = vmatprep.mubr.f32.mxu1 %v44_v42  ;;  %422 = vmatmul.mubr.f32.gmra.mrb[4].mxu0 %v43_v44  ;;  %v2810_v42 = vpack.c.bf16 %v258_v33, %v254_v32  ;;  %v296_v32 = vld [vmem:[%s5206_s1 + $0x728] sm:$0xff]  ;;  %v294_v33 = vld [vmem:[%s5206_s1 + $0x718] sm:$0xff]  ;;  %v305_v54 = vld [vmem:[%s5206_s1 + $0x770] sm:$0xff] }
  0x4e   :  { %2665 = vmatpush1.bf16.msra.mxu0 %v2664_v43  ;;  %648 = vmatmul.mubr.f32.gmra.mrb[4].mxu1 %v43_v44  ;;  %v257_v43 = vld [vmem:[%s5206_s1 + $0x5f0] sm:$0xff]  ;;  %v260_v44 = vld [vmem:[%s5206_s1 + $0x608] sm:$0xff] }
  0x4f   :  { %2793 = vmatpush1.bf16.msra.mxu1 %v2792_v45  ;;  %2667 = vmatprep.subr.bf16.mxu0 %v2666_v46  ;;  %v264_v45 = vld [vmem:[%s5206_s1 + $0x628] sm:$0xff]  ;;  %v262_v46 = vld [vmem:[%s5206_s1 + $0x618] sm:$0xff]  ;;  %v2812_v51 = vpack.c.bf16 %v257_v43, %v253_v41  ;;  %v313_v2 = vld [vmem:[%s5206_s1 + $0x7b0] sm:$0xff] }
  0x50   :  { %2795 = vmatprep.subr.bf16.mxu1 %v2794_v50  ;;  %427 = vmatprep.mubr.f32.mxu0 %v48_v56  ;;  %v63_v50 = vld [vmem:[%s5207_s0 + $0xe0] sm:$0xff]  ;;  %v2686_v52 = vpack.c.bf16 %v264_v45, %v260_v44  ;;  %v300_v43 = vld [vmem:[%s5206_s1 + $0x748] sm:$0xff]  ;;  %v302_v45 = vld [vmem:[%s5206_s1 + $0x758] sm:$0xff] }
  0x51   :  { %653 = vmatprep.mubr.f32.mxu1 %v48_v56  ;;  %428 = vmatmul.mubr.f32.gmra.mrb[6].mxu0 %v47_v58  ;;  %v2814_v56 = vpack.c.bf16 %v266_v47, %v262_v46  ;;  %v304_v44 = vld [vmem:[%s5206_s1 + $0x768] sm:$0xff]  ;;  %v306_v46 = vld [vmem:[%s5206_s1 + $0x778] sm:$0xff] }
  0x52   :  { %2669 = vmatpush1.bf16.msra.mxu0 %v2668_v57  ;;  %654 = vmatmul.mubr.f32.gmra.mrb[6].mxu1 %v47_v58  ;;  %v265_v57 = vld [vmem:[%s5206_s1 + $0x630] sm:$0xff]  ;;  %v268_v58 = vld [vmem:[%s5206_s1 + $0x648] sm:$0xff]  ;;  %v2834_v53 = vpack.c.bf16 %v306_v46, %v302_v45  ;;  %v848_v45 = vld [vmem:[%s5208_s2 + $0x98] sm:$0xff] }
  0x53   :  { %2797 = vmatpush1.bf16.msra.mxu1 %v2796_v59  ;;  %2671 = vmatprep.subr.bf16.mxu0 %v2670_v60  ;;  %v272_v59 = vld [vmem:[%s5206_s1 + $0x668] sm:$0xff]  ;;  %v270_v60 = vld [vmem:[%s5206_s1 + $0x658] sm:$0xff] }
  0x54   :  { %2799 = vmatprep.subr.bf16.mxu1 %v2798_v0  ;;  %433 = vmatprep.mubr.f32.mxu0 %v52_v6  ;;  %v2816_v0 = vpack.c.bf16 %v265_v57, %v261_v55  ;;  %v2690_v1 = vpack.c.bf16 %v272_v59, %v268_v58  ;;  %v2818_v5 = vpack.c.bf16 %v274_v61, %v270_v60  ;;  %v308_v55 = vld [vmem:[%s5206_s1 + $0x788] sm:$0xff]  ;;  %v310_v57 = vld [vmem:[%s5206_s1 + $0x798] sm:$0xff] }
  0x55   :  { %659 = vmatprep.mubr.f32.mxu1 %v52_v6  ;;  %434 = vmatmul.mubr.f32.gmra.mrb[8].mxu0 %v51_v8  ;;  %v273_v6 = vld [vmem:[%s5206_s1 + $0x670] sm:$0xff]  ;;  %v314_v58 = vld [vmem:[%s5206_s1 + $0x7b8] sm:$0xff] }
  0x56   :  { %2673 = vmatpush1.bf16.msra.mxu0 %v2672_v7  ;;  %660 = vmatmul.mubr.f32.gmra.mrb[8].mxu1 %v51_v8  ;;  %v276_v7 = vld [vmem:[%s5206_s1 + $0x688] sm:$0xff]  ;;  %v2820_v12 = vpack.c.bf16 %v273_v6, %v269_v4  ;;  %v322_v6 = vld [vmem:[%s5206_s1 + $0x7f8] sm:$0xff] }
  0x57   :  { %2801 = vmatpush1.bf16.msra.mxu1 %v2800_v9  ;;  %2675 = vmatprep.subr.bf16.mxu0 %v2674_v10  ;;  %v280_v8 = vld [vmem:[%s5206_s1 + $0x6a8] sm:$0xff]  ;;  %v278_v9 = vld [vmem:[%s5206_s1 + $0x698] sm:$0xff] }
  0x58   :  { %2803 = vmatprep.subr.bf16.mxu1 %v2802_v14  ;;  %439 = vmatprep.mubr.f32.mxu0 %v56_v20  ;;  %v282_v10 = vld [vmem:[%s5206_s1 + $0x6b8] sm:$0xff]  ;;  %v2694_v13 = vpack.c.bf16 %v280_v8, %v276_v7  ;;  %v275_v14 = vld [vmem:[%s5206_s1 + $0x680] sm:$0xff]  ;;  %v320_v4 = vld [vmem:[%s5206_s1 + $0x7e8] sm:$0xff] }
  0x59   :  { %665 = vmatprep.mubr.f32.mxu1 %v56_v20  ;;  %440 = vmatmul.mubr.f32.gmra.mrb[10].mxu0 %v55_v22  ;;  %v2822_v17 = vpack.c.bf16 %v282_v10, %v278_v9  ;;  %v288_v20 = vld [vmem:[%s5206_s1 + $0x6e8] sm:$0xff]  ;;  %v2714_v9 = vpack.c.bf16 %v320_v4, %v316_v3  ;;  %v315_v10 = vld [vmem:[%s5206_s1 + $0x7c0] sm:$0xff]  ;;  %v852_v46 = vld [vmem:[%s5208_s2 + $0xb8] sm:$0xff] }
  0x5a   :  { %2677 = vmatpush1.bf16.msra.mxu0 %v2676_v21  ;;  %666 = vmatmul.mubr.f32.gmra.mrb[10].mxu1 %v55_v22  ;;  %v286_v21 = vld [vmem:[%s5206_s1 + $0x6d8] sm:$0xff]  ;;  %v2698_v25 = vpack.c.bf16 %v288_v20, %v284_v19  ;;  %v859_v3 = vld [vmem:[%s5208_s2 + $0xf0] sm:$0xff] }
  0x5b   :  { %2805 = vmatpush1.bf16.msra.mxu1 %v2804_v23  ;;  %2679 = vmatprep.subr.bf16.mxu0 %v2678_v24  ;;  %v290_v22 = vld [vmem:[%s5206_s1 + $0x6f8] sm:$0xff]  ;;  %v2696_v23 = vpack.c.bf16 %v279_v15, %v275_v14  ;;  %v2824_v24 = vpack.c.bf16 %v281_v18, %v277_v16  ;;  %v321_v14 = vld [vmem:[%s5206_s1 + $0x7f0] sm:$0xff]  ;;  %v830_v15 = vld [vmem:[%s5208_s2 + $0x8] sm:$0xff] }
  0x5c   :  { %2807 = vmatprep.subr.bf16.mxu1 %v2806_v28  ;;  %445 = vmatprep.mubr.f32.mxu0 %v60_v34  ;;  %v285_v28 = vld [vmem:[%s5206_s1 + $0x6d0] sm:$0xff]  ;;  %v2826_v29 = vpack.c.bf16 %v290_v22, %v286_v21  ;;  %v834_v16 = vld [vmem:[%s5208_s2 + $0x28] sm:$0xff]  ;;  %v836_v18 = vld [vmem:[%s5208_s2 + $0x38] sm:$0xff] }
  0x5d   :  { %671 = vmatprep.mubr.f32.mxu1 %v60_v34  ;;  %446 = vmatmul.mubr.f32.gmra.mrb[12].mxu0 %v59_v36  ;;  %v298_v34 = vld [vmem:[%s5206_s1 + $0x738] sm:$0xff]  ;;  %v4498_v21 = vpack.c.bf16 %v834_v16, %v830_v15  ;;  %v829_v22 = vld [vmem:[%s5208_s2] sm:$0xff]  ;;  %v863_v16 = vld [vmem:[%s5208_s2 + $0x110] sm:$0xff] }
  0x5e   :  { %2681 = vmatpush1.bf16.msra.mxu0 %v2680_v35  ;;  %672 = vmatmul.mubr.f32.gmra.mrb[12].mxu1 %v59_v36  ;;  %v2700_v35 = vpack.c.bf16 %v287_v27, %v283_v26  ;;  %v2828_v36 = vpack.c.bf16 %v289_v30, %v285_v28  ;;  %v2830_v41 = vpack.c.bf16 %v298_v34, %v294_v33  ;;  %v835_v26 = vld [vmem:[%s5208_s2 + $0x30] sm:$0xff]  ;;  %v838_v27 = vld [vmem:[%s5208_s2 + $0x48] sm:$0xff]  ;;  %v837_v34 = vld [vmem:[%s5208_s2 + $0x40] sm:$0xff] }
  0x5f   :  { %2809 = vmatpush1.bf16.msra.mxu1 %v2808_v37  ;;  %2683 = vmatprep.subr.bf16.mxu0 %v2682_v38  ;;  %v2702_v37 = vpack.c.bf16 %v296_v32, %v292_v31  ;;  %v291_v38 = vld [vmem:[%s5206_s1 + $0x700] sm:$0xff]  ;;  %v842_v28 = vld [vmem:[%s5208_s2 + $0x68] sm:$0xff]  ;;  %v840_v31 = vld [vmem:[%s5208_s2 + $0x58] sm:$0xff] }
  0x60   :  { %2811 = vmatprep.subr.bf16.mxu1 %v2810_v42  ;;  %451 = vmatprep.mubr.f32.mxu0 %v64_v48  ;;  %v297_v42 = vld [vmem:[%s5206_s1 + $0x730] sm:$0xff]  ;;  %v2704_v47 = vpack.c.bf16 %v295_v39, %v291_v38  ;;  %v844_v32 = vld [vmem:[%s5208_s2 + $0x78] sm:$0xff] }
  0x61   :  { %677 = vmatprep.mubr.f32.mxu1 %v64_v48  ;;  %452 = vmatmul.mubr.f32.gmra.mrb[14].mxu0 %v63_v50  ;;  %v2832_v48 = vpack.c.bf16 %v297_v42, %v293_v40  ;;  %v839_v38 = vld [vmem:[%s5208_s2 + $0x50] sm:$0xff]  ;;  %v4552_v40 = vpack.c.bf16 %v844_v32, %v840_v31  ;;  %v850_v42 = vld [vmem:[%s5208_s2 + $0xa8] sm:$0xff]  ;;  %v58_v31 = vld [vmem:[%s5207_s0 + $0xb8] sm:$0xff] }
  0x62   :  { %2685 = vmatpush1.bf16.msra.mxu0 %v2684_v49  ;;  %678 = vmatmul.mubr.f32.gmra.mrb[14].mxu1 %v63_v50  ;;  %v2706_v49 = vpack.c.bf16 %v304_v44, %v300_v43  ;;  %v299_v50 = vld [vmem:[%s5206_s1 + $0x740] sm:$0xff]  ;;  %v843_v39 = vld [vmem:[%s5208_s2 + $0x70] sm:$0xff] }
  0x63   :  { %2813 = vmatpush1.bf16.msra.mxu1 %v2812_v51  ;;  %2687 = vmatprep.subr.bf16.mxu0 %v2686_v52  ;;  %v303_v51 = vld [vmem:[%s5206_s1 + $0x760] sm:$0xff]  ;;  %v301_v52 = vld [vmem:[%s5206_s1 + $0x750] sm:$0xff] }
  0x64   :  { %2815 = vmatprep.subr.bf16.mxu1 %v2814_v56  ;;  %522 = vmatprep.mubr.f32.mxu0 %v38_v62  ;;  %v312_v56 = vld [vmem:[%s5206_s1 + $0x7a8] sm:$0xff]  ;;  %v2708_v59 = vpack.c.bf16 %v303_v51, %v299_v50  ;;  %v2836_v60 = vpack.c.bf16 %v305_v54, %v301_v52  ;;  %v41_v43 = vld [vmem:[%s5207_s0 + $0x30] sm:$0xff]  ;;  %v46_v50 = vld [vmem:[%s5207_s0 + $0x58] sm:$0xff]  ;;  %v4594_v54 = vpack.c.bf16 %v852_v46, %v848_v45 }
  0x65   :  { %748 = vmatprep.mubr.f32.mxu1 %v38_v62  ;;  %v2710_v61 = vpack.c.bf16 %v312_v56, %v308_v55  ;;  %v307_v62 = vld [vmem:[%s5206_s1 + $0x780] sm:$0xff]  ;;  %v847_v52 = vld [vmem:[%s5208_s2 + $0x90] sm:$0xff]  ;;  %v854_v55 = vld [vmem:[%s5208_s2 + $0xc8] sm:$0xff] }
  0x66   :  { %2689 = vmatpush1.bf16.msra.mxu0 %v2688_v63  ;;  %v311_v63 = vld [vmem:[%s5206_s1 + $0x7a0] sm:$0xff]  ;;  %v858_v56 = vld [vmem:[%s5208_s2 + $0xe8] sm:$0xff]  ;;  %v884_v45 = vld [vmem:[%s5208_s2 + $0x1b8] sm:$0xff] }
  0x67   :  { %2817 = vmatpush1.bf16.msra.mxu1 %v2816_v0  ;;  %2691 = vmatprep.subr.bf16.mxu0 %v2690_v1  ;;  %v309_v0 = vld [vmem:[%s5206_s1 + $0x790] sm:$0xff]  ;;  %v2838_v1 = vpack.c.bf16 %v314_v58, %v310_v57  ;;  %v2712_v7 = vpack.c.bf16 %v311_v63, %v307_v62  ;;  %v853_v62 = vld [vmem:[%s5208_s2 + $0xc0] sm:$0xff] }
  0x68   :  { %2819 = vmatprep.subr.bf16.mxu1 %v2818_v5  ;;  %v318_v5 = vld [vmem:[%s5206_s1 + $0x7d8] sm:$0xff]  ;;  %v2840_v8 = vpack.c.bf16 %v313_v2, %v309_v0  ;;  %v45_v57 = vld [vmem:[%s5207_s0 + $0x50] sm:$0xff]  ;;  %v857_v63 = vld [vmem:[%s5208_s2 + $0xe0] sm:$0xff] }
  0x69   :  { %v50_v0 = vld [vmem:[%s5207_s0 + $0x78] sm:$0xff]  ;;  %v855_v2 = vld [vmem:[%s5208_s2 + $0xd0] sm:$0xff] }
  0x6a   :  { %2693 = vmatpush1.bf16.msra.mxu0 %v2692_v11  ;;  %v319_v11 = vld [vmem:[%s5206_s1 + $0x7e0] sm:$0xff] }
  0x6b   :  { %2821 = vmatpush1.bf16.msra.mxu1 %v2820_v12  ;;  %2695 = vmatprep.subr.bf16.mxu0 %v2694_v13  ;;  %v317_v12 = vld [vmem:[%s5206_s1 + $0x7d0] sm:$0xff]  ;;  %v2842_v13 = vpack.c.bf16 %v322_v6, %v318_v5  ;;  %v2716_v19 = vpack.c.bf16 %v319_v11, %v315_v10  ;;  %v862_v5 = vld [vmem:[%s5208_s2 + $0x108] sm:$0xff]  ;;  %v868_v10 = vld [vmem:[%s5208_s2 + $0x138] sm:$0xff]  ;;  %v4657_v11 = vpack.c.bf16 %v859_v3, %v855_v2 }
  0x6c   :  { %2823 = vmatprep.subr.bf16.mxu1 %v2822_v17  ;;  %v832_v17 = vld [vmem:[%s5208_s2 + $0x18] sm:$0xff]  ;;  %v2844_v20 = vpack.c.bf16 %v321_v14, %v317_v12  ;;  %v866_v6 = vld [vmem:[%s5208_s2 + $0x128] sm:$0xff]  ;;  %v861_v12 = vld [vmem:[%s5208_s2 + $0x100] sm:$0xff] }
  0x6d   :  { %v54_v14 = vld [vmem:[%s5207_s0 + $0x98] sm:$0xff]  ;;  %v4669_v15 = vpack.c.bf16 %v866_v6, %v862_v5  ;;  %v885_v3 = vld [vmem:[%s5208_s2 + $0x1c0] sm:$0xff] }
  0x6e   :  { %2697 = vmatpush1.bf16.msra.mxu0 %v2696_v23  ;;  %v833_v23 = vld [vmem:[%s5208_s2 + $0x20] sm:$0xff]  ;;  %v66_v6 = vld [vmem:[%s5207_s0 + $0xf8] sm:$0xff] }
  0x6f   :  { %2825 = vmatpush1.bf16.msra.mxu1 %v2824_v24  ;;  %2699 = vmatprep.subr.bf16.mxu0 %v2698_v25  ;;  %v4506_v24 = vpack.c.bf16 %v836_v18, %v832_v17  ;;  %v831_v25 = vld [vmem:[%s5208_s2 + $0x10] sm:$0xff]  ;;  %v4523_v30 = vpack.c.bf16 %v833_v23, %v829_v22  ;;  %v889_v5 = vld [vmem:[%s5208_s2 + $0x1e0] sm:$0xff] }
  0x70   :  { %2827 = vmatprep.subr.bf16.mxu1 %v2826_v29  ;;  %v37_v29 = vld [vmem:[%s5207_s0 + $0x10] sm:$0xff]  ;;  %v4532_v33 = vpack.c.bf16 %v835_v26, %v831_v25  ;;  %v872_v25 = vld [vmem:[%s5208_s2 + $0x158] sm:$0xff] }
  0x71   :  { %v867_v17 = vld [vmem:[%s5208_s2 + $0x130] sm:$0xff]  ;;  %v876_v26 = vld [vmem:[%s5208_s2 + $0x178] sm:$0xff] }
  0x72   :  { %2701 = vmatpush1.bf16.msra.mxu0 %v2700_v35  ;;  %v841_v35 = vld [vmem:[%s5208_s2 + $0x60] sm:$0xff]  ;;  %v53_v22 = vld [vmem:[%s5207_s0 + $0x90] sm:$0xff] }
  0x73   :  { %2829 = vmatpush1.bf16.msra.mxu1 %v2828_v36  ;;  %2703 = vmatprep.subr.bf16.mxu0 %v2702_v37  ;;  %v42_v36 = vld [vmem:[%s5207_s0 + $0x38] sm:$0xff]  ;;  %v4544_v37 = vpack.c.bf16 %v842_v28, %v838_v27  ;;  %v4564_v44 = vpack.c.bf16 %v841_v35, %v837_v34  ;;  %v4699_v27 = vpack.c.bf16 %v867_v17, %v863_v16  ;;  %v869_v28 = vld [vmem:[%s5208_s2 + $0x140] sm:$0xff]  ;;  %v871_v34 = vld [vmem:[%s5208_s2 + $0x150] sm:$0xff]  ;;  %v3619_v17 = vmov 0.0  }
  0x74   :  { %2831 = vmatprep.subr.bf16.mxu1 %v2830_v41  ;;  %v846_v41 = vld [vmem:[%s5208_s2 + $0x88] sm:$0xff]  ;;  %v875_v35 = vld [vmem:[%s5208_s2 + $0x170] sm:$0xff] }
  0x75   :  { %v4585_v51 = vpack.c.bf16 %v850_v42, %v846_v41  ;;  %v57_v41 = vld [vmem:[%s5207_s0 + $0xb0] sm:$0xff]  ;;  %v4741_v46 = vpack.c.bf16 %v875_v35, %v871_v34 }
  0x76   :  { %2705 = vmatpush1.bf16.msra.mxu0 %v2704_v47  ;;  %v4573_v47 = vpack.c.bf16 %v843_v39, %v839_v38  ;;  %v878_v38 = vld [vmem:[%s5208_s2 + $0x188] sm:$0xff] }
  0x77   :  { %2833 = vmatpush1.bf16.msra.mxu1 %v2832_v48  ;;  %2707 = vmatprep.subr.bf16.mxu0 %v2706_v49  ;;  %v845_v48 = vld [vmem:[%s5208_s2 + $0x80] sm:$0xff]  ;;  %v882_v39 = vld [vmem:[%s5208_s2 + $0x1a8] sm:$0xff] }
  0x78   :  { %2835 = vmatprep.subr.bf16.mxu1 %v2834_v53  ;;  %v849_v49 = vld [vmem:[%s5208_s2 + $0xa0] sm:$0xff]  ;;  %v851_v53 = vld [vmem:[%s5208_s2 + $0xb0] sm:$0xff] }
  0x79   :  { %v4606_v58 = vpack.c.bf16 %v849_v49, %v845_v48  ;;  %v877_v48 = vld [vmem:[%s5208_s2 + $0x180] sm:$0xff] }
  0x7a   :  { %2709 = vmatpush1.bf16.msra.mxu0 %v2708_v59  ;;  %v856_v59 = vld [vmem:[%s5208_s2 + $0xd8] sm:$0xff]  ;;  %v881_v49 = vld [vmem:[%s5208_s2 + $0x1a0] sm:$0xff] }
  0x7b   :  { %2837 = vmatpush1.bf16.msra.mxu1 %v2836_v60  ;;  %2711 = vmatprep.subr.bf16.mxu0 %v2710_v61  ;;  %v860_v60 = vld [vmem:[%s5208_s2 + $0xf8] sm:$0xff]  ;;  %v4615_v61 = vpack.c.bf16 %v851_v53, %v847_v52  ;;  %v4753_v52 = vpack.c.bf16 %v882_v39, %v878_v38  ;;  %v879_v53 = vld [vmem:[%s5208_s2 + $0x190] sm:$0xff] }
  0x7c   :  { %2839 = vmatprep.subr.bf16.mxu1 %v2838_v1  ;;  %v4627_v1 = vpack.c.bf16 %v858_v56, %v854_v55  ;;  %v4636_v4 = vpack.c.bf16 %v860_v60, %v856_v59  ;;  %v883_v55 = vld [vmem:[%s5208_s2 + $0x1b0] sm:$0xff]  ;;  %v890_v59 = vld [vmem:[%s5208_s2 + $0x1e8] sm:$0xff] }
  0x7d   :  { %v61_v60 = vld [vmem:[%s5207_s0 + $0xd0] sm:$0xff]  ;;  %v4783_v2 = vpack.c.bf16 %v883_v55, %v879_v53 }
  0x7e   :  { %2713 = vmatpush1.bf16.msra.mxu0 %v2712_v7  ;;  %v49_v7 = vld [vmem:[%s5207_s0 + $0x70] sm:$0xff] }
  0x7f   :  { %2841 = vmatpush1.bf16.msra.mxu1 %v2840_v8  ;;  %2715 = vmatprep.subr.bf16.mxu0 %v2714_v9  ;;  %v4648_v8 = vpack.c.bf16 %v857_v63, %v853_v62  ;;  %v864_v9 = vld [vmem:[%s5208_s2 + $0x118] sm:$0xff]  ;;  %v4774_v62 = vpack.c.bf16 %v881_v49, %v877_v48 }
  0x80   :  { %2843 = vmatprep.subr.bf16.mxu1 %v2842_v13  ;;  %v865_v13 = vld [vmem:[%s5208_s2 + $0x120] sm:$0xff]  ;;  %v4678_v18 = vpack.c.bf16 %v868_v10, %v864_v9  ;;  %v888_v63 = vld [vmem:[%s5208_s2 + $0x1d8] sm:$0xff]  ;;  %v887_v9 = vld [vmem:[%s5208_s2 + $0x1d0] sm:$0xff] }
  0x81   :  { %v4690_v23 = vpack.c.bf16 %v865_v13, %v861_v12  ;;  %v891_v10 = vld [vmem:[%s5208_s2 + $0x1f0] sm:$0xff] }
  0x82   :  { %2717 = vmatpush1.bf16.msra.mxu0 %v2716_v19  ;;  %v870_v19 = vld [vmem:[%s5208_s2 + $0x148] sm:$0xff]  ;;  %v65_v13 = vld [vmem:[%s5207_s0 + $0xf0] sm:$0xff]  ;;  %v4813_v16 = vpack.c.bf16 %v891_v10, %v887_v9 }
  0x83   :  { %2845 = vmatpush1.bf16.msra.mxu1 %v2844_v20  ;;  %2847 = vmatprep.subr.bf16.mxu0 %v4498_v21  ;;  %v874_v20 = vld [vmem:[%s5208_s2 + $0x168] sm:$0xff] }
  0x84   :  { %2879 = vmatprep.subr.bf16.mxu1 %v4506_v24  ;;  %v4711_v32 = vpack.c.bf16 %v874_v20, %v870_v19  ;;  %v325_v19 = vlaneseq }
  0x85   :  { %523 = vmatmul.mubr.f32.vlgmr.msra.gmra.mrb[0].mxu0 %v37_v29 }
  0x86   :  { %749 = vmatmul.mubr.f32.vlgmr.msra.gmra.mrb[0].mxu1 %v37_v29  ;;  %2849 = vmatpush1.bf16.msra.mxu0 %v4523_v30  ;;  %v873_v29 = vld [vmem:[%s5208_s2 + $0x160] sm:$0xff]  ;;  %v326_v20 = vshrl.u32 %v325_v19, 7 }
  0x87   :  { %2881 = vmatpush1.bf16.msra.mxu1 %v4532_v33  ;;  %528 = vmatprep.mubr.f32.mxu0 %v42_v36  ;;  %v4732_v42 = vpack.c.bf16 %v873_v29, %v869_v28 }
  0x88   :  { %754 = vmatprep.mubr.f32.mxu1 %v42_v36  ;;  %2851 = vmatprep.subr.bf16.mxu0 %v4544_v37  ;;  %v4720_v36 = vpack.c.bf16 %v876_v26, %v872_v25  ;;  %v323_v25 = vld [vmem:[%s5209_s3] sm:$0xf]  ;;  %v331_v26 = vsub.s32 1, %v326_v20  ;;  %v339_v34 = vsub.s32 3, %v326_v20 }
  0x89   :  { %529 = vmatmul.mubr.f32.gmra.mrb[2].mxu0 %v41_v43  ;;  %2883 = vmatprep.subr.bf16.mxu1 %v4552_v40 }
  0x8a   :  { %755 = vmatmul.mubr.f32.gmra.mrb[2].mxu1 %v41_v43  ;;  %2853 = vmatpush1.bf16.msra.mxu0 %v4564_v44  ;;  %v880_v43 = vld [vmem:[%s5208_s2 + $0x198] sm:$0xff]  ;;  %v4864_v29 = vrot.slane %v323_v25, %v331_v26  ;;  %v4868_v49 = vrot.slane %v323_v25, %v339_v34 }
  0x8b   :  { %2885 = vmatpush1.bf16.msra.mxu1 %v4573_v47  ;;  %534 = vmatprep.mubr.f32.mxu0 %v46_v50  ;;  %v4762_v56 = vpack.c.bf16 %v884_v45, %v880_v43 }
  0x8c   :  { %760 = vmatprep.mubr.f32.mxu1 %v46_v50  ;;  %2855 = vmatprep.subr.bf16.mxu0 %v4585_v51  ;;  %v62_v50 = vld [vmem:[%s5207_s0 + $0xd8] sm:$0xff] }
  0x8d   :  { %535 = vmatmul.mubr.f32.gmra.mrb[4].mxu0 %v45_v57  ;;  %2887 = vmatprep.subr.bf16.mxu1 %v4594_v54 }
  0x8e   :  { %761 = vmatmul.mubr.f32.gmra.mrb[4].mxu1 %v45_v57  ;;  %2857 = vmatpush1.bf16.msra.mxu0 %v4606_v58  ;;  %v886_v57 = vld [vmem:[%s5208_s2 + $0x1c8] sm:$0xff] }
  0x8f   :  { %2889 = vmatpush1.bf16.msra.mxu1 %v4615_v61  ;;  %540 = vmatprep.mubr.f32.mxu0 %v50_v0 }
  0x90   :  { %766 = vmatprep.mubr.f32.mxu1 %v50_v0  ;;  %2859 = vmatprep.subr.bf16.mxu0 %v4627_v1  ;;  %v892_v0 = vld [vmem:[%s5208_s2 + $0x1f8] sm:$0xff] }
  0x91   :  { %541 = vmatmul.mubr.f32.gmra.mrb[6].mxu0 %v49_v7  ;;  %2891 = vmatprep.subr.bf16.mxu1 %v4636_v4  ;;  %v4804_v12 = vpack.c.bf16 %v892_v0, %v888_v63 }
  0x92   :  { %767 = vmatmul.mubr.f32.gmra.mrb[6].mxu1 %v49_v7  ;;  %2861 = vmatpush1.bf16.msra.mxu0 %v4648_v8  ;;  %v4795_v7 = vpack.c.bf16 %v890_v59, %v886_v57 }
  0x93   :  { %2893 = vmatpush1.bf16.msra.mxu1 %v4657_v11  ;;  %546 = vmatprep.mubr.f32.mxu0 %v54_v14 }
  0x94   :  { %772 = vmatprep.mubr.f32.mxu1 %v54_v14  ;;  %2863 = vmatprep.subr.bf16.mxu0 %v4669_v15  ;;  %v4810_v14 = vpack.c.bf16 %v889_v5, %v885_v3 }
  0x95   :  { %547 = vmatmul.mubr.f32.gmra.mrb[8].mxu0 %v53_v22  ;;  %2895 = vmatprep.subr.bf16.mxu1 %v4678_v18 }
  0x96   :  { %773 = vmatmul.mubr.f32.gmra.mrb[8].mxu1 %v53_v22  ;;  %2865 = vmatpush1.bf16.msra.mxu0 %v4690_v23  ;;  %v327_v22 = vsub.s32 0, %v326_v20 }
  0x97   :  { %2897 = vmatpush1.bf16.msra.mxu1 %v4699_v27  ;;  %552 = vmatprep.mubr.f32.mxu0 %v58_v31 }
  0x98   :  { %778 = vmatprep.mubr.f32.mxu1 %v58_v31  ;;  %2867 = vmatprep.subr.bf16.mxu0 %v4711_v32  ;;  %v4862_v28 = vrot.slane %v323_v25, %v327_v22 }
  0x99   :  { %553 = vmatmul.mubr.f32.gmra.mrb[10].mxu0 %v57_v41  ;;  %2899 = vmatprep.subr.bf16.mxu1 %v4720_v36 }
  0x9a   :  { %779 = vmatmul.mubr.f32.gmra.mrb[10].mxu1 %v57_v41  ;;  %2869 = vmatpush1.bf16.msra.mxu0 %v4732_v42 }
  0x9b   :  { %2901 = vmatpush1.bf16.msra.mxu1 %v4741_v46  ;;  %558 = vmatprep.mubr.f32.mxu0 %v62_v50 }
  0x9c   :  { %784 = vmatprep.mubr.f32.mxu1 %v62_v50  ;;  %2871 = vmatprep.subr.bf16.mxu0 %v4753_v52  ;;  %v335_v50 = vsub.s32 2, %v326_v20 }
  0x9d   :  { %559 = vmatmul.mubr.f32.gmra.mrb[12].mxu0 %v61_v60  ;;  %2903 = vmatprep.subr.bf16.mxu1 %v4762_v56 }
  0x9e   :  { %785 = vmatmul.mubr.f32.gmra.mrb[12].mxu1 %v61_v60  ;;  %2873 = vmatpush1.bf16.msra.mxu0 %v4774_v62  ;;  %v4871_v55 = vrot.slane %v323_v25, %v335_v50 }
  0x9f   :  { %2905 = vmatpush1.bf16.msra.mxu1 %v4783_v2  ;;  %564 = vmatprep.mubr.f32.mxu0 %v66_v6 }
  0xa0   :  { %790 = vmatprep.mubr.f32.mxu1 %v66_v6  ;;  %2875 = vmatprep.subr.bf16.mxu0 %v4795_v7 }
  0xa1   :  { %565 = vmatmul.mubr.f32.gmra.mrb[14].mxu0 %v65_v13  ;;  %2907 = vmatprep.subr.bf16.mxu1 %v4804_v12 }
  0xa2   :  { %791 = vmatmul.mubr.f32.gmra.mrb[14].mxu1 %v65_v13  ;;  %2877 = vmatpush1.bf16.msra.mxu0 %v4810_v14 }
  0xa3   :  { %2909 = vmatpush1.bf16.msra.mxu1 %v4813_v16  ;;  %963 = vmatprep.mubr.f32.mxu0 %v3619_v17 }
  0xa4   :  { %1034 = vmatprep.mubr.f32.mxu1 %v3619_v17  ;;  %2911 = vmatprep.subr.bf16.mxu0 %v4498_v21 }
  0xa5   :  { %964 = vmatmul.mubr.f32.vlgmr.msra.gmra.mrb[0].mxu0 %v3619_v17  ;;  %2943 = vmatprep.subr.bf16.mxu1 %v4506_v24 }
  0xa6   :  { %1035 = vmatmul.mubr.f32.vlgmr.msra.gmra.mrb[0].mxu1 %v3619_v17  ;;  %2913 = vmatpush1.bf16.msra.mxu0 %v4523_v30 }
  0xa7   :  { %2945 = vmatpush1.bf16.msra.mxu1 %v4532_v33  ;;  %2915 = vmatprep.subr.bf16.mxu0 %v4544_v37 }
  0xa8   :  { %2947 = vmatprep.subr.bf16.mxu1 %v4552_v40  ;;  %1138 = vmatprep.mubr.f32.mxu0 %v3619_v17 }
  0xa9   :  { %1209 = vmatprep.mubr.f32.mxu1 %v3619_v17 }
  0xaa   :  { %2917 = vmatpush1.bf16.msra.mxu0 %v4564_v44 }
  0xab   :  { %2949 = vmatpush1.bf16.msra.mxu1 %v4573_v47  ;;  %2919 = vmatprep.subr.bf16.mxu0 %v4585_v51 }
  0xac   :  { %2951 = vmatprep.subr.bf16.mxu1 %v4594_v54 }
  0xae   :  { %2921 = vmatpush1.bf16.msra.mxu0 %v4606_v58 }
  0xaf   :  { %2953 = vmatpush1.bf16.msra.mxu1 %v4615_v61  ;;  %2923 = vmatprep.subr.bf16.mxu0 %v4627_v1 }
  0xb0   :  { %2955 = vmatprep.subr.bf16.mxu1 %v4636_v4 }
  0xb2   :  { %2925 = vmatpush1.bf16.msra.mxu0 %v4648_v8 }
  0xb3   :  { %2957 = vmatpush1.bf16.msra.mxu1 %v4657_v11  ;;  %2927 = vmatprep.subr.bf16.mxu0 %v4669_v15 }
  0xb4   :  { %2959 = vmatprep.subr.bf16.mxu1 %v4678_v18 }
  0xb6   :  { %2929 = vmatpush1.bf16.msra.mxu0 %v4690_v23 }
  0xb7   :  { %2961 = vmatpush1.bf16.msra.mxu1 %v4699_v27  ;;  %2931 = vmatprep.subr.bf16.mxu0 %v4711_v32 }
  0xb8   :  { %2963 = vmatprep.subr.bf16.mxu1 %v4720_v36 }
  0xba   :  { %2933 = vmatpush1.bf16.msra.mxu0 %v4732_v42 }
  0xbb   :  { %2965 = vmatpush1.bf16.msra.mxu1 %v4741_v46  ;;  %2935 = vmatprep.subr.bf16.mxu0 %v4753_v52 }
  0xbc   :  { %2967 = vmatprep.subr.bf16.mxu1 %v4762_v56 }
  0xbe   :  { %2937 = vmatpush1.bf16.msra.mxu0 %v4774_v62 }
  0xbf   :  { %2969 = vmatpush1.bf16.msra.mxu1 %v4783_v2  ;;  %2939 = vmatprep.subr.bf16.mxu0 %v4795_v7 }
  0xc0   :  { %2971 = vmatprep.subr.bf16.mxu1 %v4804_v12 }
  0xc2   :  { %2941 = vmatpush1.bf16.msra.mxu0 %v4810_v14 }
  0xc3   :  { %2973 = vmatpush1.bf16.msra.mxu1 %v4813_v16  ;;  %2975 = vmatprep.subr.bf16.mxu0 %v4498_v21 }
  0xc4   :  { %3007 = vmatprep.subr.bf16.mxu1 %v4506_v24 }
 0x178   :  { %v965_v31 = vpop.f32.mrb[0].mxu0 }
 0x179   :  { %v3388_v35 = vadd.f32 %v965_v31, %v4862_v28  ;;  %v1036_v38 = vpop.f32.mrb[0].mxu1  ;;  %v967_v39 = vpop.f32.mrb[1].mxu0 }
 0x17a   :  { %v3389_v41 = vadd.f32 %v967_v39, %v4864_v29  ;;  %v1038_v43 = vpop.f32.mrb[1].mxu1  ;;  %v3404_v59 = vadd.f32 %v1036_v38, %v4871_v55 }
 0x17b   :  { %v2495_v45 = vmul.f32 -1.442695, %v3388_v35  ;;  %v3405_v53 = vadd.f32 %v1038_v43, %v4868_v49 }
 0x17c   :  { %v2496_v48 = vmul.f32 -1.442695, %v3389_v41 }
 0x17d   :  { %3487 = vpow2.f32 %v2495_v45  ;;  %v2497_v57 = vmul.f32 -1.442695, %v3405_v53 }
 0x17e   :  { %3489 = vpow2.f32 %v2496_v48 }
 0x17f   :  { %3491 = vpow2.f32 %v2497_v57 }
 0x180   :  { %3493 = vtanh.f32 %v3404_v59 }
 0x187   :  { %v3488_v60 = vpop.eup %3487 }
 0x188   :  { %v3490_v63 = vpop.eup %3489  ;;  %v1048_v0 = vadd.f32 1.0, %v3488_v60 }
 0x189   :  { %v1054_v3 = vadd.f32 1.0, %v3490_v63  ;;  %v3492_v5 = vpop.eup %3491 }
 0x18a   :  { %3495 = vrcp.f32 %v1048_v0  ;;  %v3494_v6 = vpop.eup %3493  ;;  %v1061_v19 = vadd.f32 1.0, %v3492_v5 }
 0x18b   :  { %3497 = vrcp.f32 %v1054_v3 }
 0x18c   :  { %3499 = vrcp.f32 %v1061_v19 }
 0x194   :  { %v3496_v9 = vpop.eup %3495 }
 0x195   :  { %v3498_v10 = vpop.eup %3497  ;;  %v1065_v13 = vmul.f32 %v3496_v9, %v3494_v6 }
 0x196   :  { %v1064_v20 = vmul.f32 0.0, %v3498_v10  ;;  %v3500_v25 = vpop.eup %3499 }
 0x198   :  { %v4874_v22 = vadd.f32 %v1065_v13, %v1064_v20 }
 0x19a   :  { %3501 = vtanh.f32 %v4874_v22 }
 0x1a4   :  { %v3502_v26 = vpop.eup %3501 }
 0x1a5   :  { %v1068_v31 = vmul.f32 %v3502_v26, %v3500_v25 }
 0x1a7   :  { %1139 = vmatmul.mubr.f32.vlgmr.msra.gmra.mrb[2].mxu0 %v1068_v31  ;;  %1210 = vmatmul.mubr.f32.vlgmr.msra.gmra.mrb[2].mxu1 %v1068_v31 }
 0x1a8   :  { %2977 = vmatpush1.bf16.msra.mxu0 %v4523_v30  ;;  %3009 = vmatpush1.bf16.msra.mxu1 %v4532_v33 }
 0x1a9   :  { %2979 = vmatprep.subr.bf16.mxu0 %v4544_v37  ;;  %3011 = vmatprep.subr.bf16.mxu1 %v4552_v40 }
 0x1aa   :  { %1313 = vmatprep.mubr.f32.mxu0 %v3619_v17  ;;  %1384 = vmatprep.mubr.f32.mxu1 %v3619_v17 }
 0x1ac   :  { %2981 = vmatpush1.bf16.msra.mxu0 %v4564_v44  ;;  %3013 = vmatpush1.bf16.msra.mxu1 %v4573_v47 }
 0x1ad   :  { %2983 = vmatprep.subr.bf16.mxu0 %v4585_v51  ;;  %3015 = vmatprep.subr.bf16.mxu1 %v4594_v54 }
 0x1b0   :  { %2985 = vmatpush1.bf16.msra.mxu0 %v4606_v58  ;;  %3017 = vmatpush1.bf16.msra.mxu1 %v4615_v61 }
 0x1b1   :  { %2987 = vmatprep.subr.bf16.mxu0 %v4627_v1  ;;  %3019 = vmatprep.subr.bf16.mxu1 %v4636_v4 }
 0x1b4   :  { %2989 = vmatpush1.bf16.msra.mxu0 %v4648_v8  ;;  %3021 = vmatpush1.bf16.msra.mxu1 %v4657_v11 }
 0x1b5   :  { %2991 = vmatprep.subr.bf16.mxu0 %v4669_v15  ;;  %3023 = vmatprep.subr.bf16.mxu1 %v4678_v18 }
 0x1b8   :  { %2993 = vmatpush1.bf16.msra.mxu0 %v4690_v23  ;;  %3025 = vmatpush1.bf16.msra.mxu1 %v4699_v27 }
 0x1b9   :  { %2995 = vmatprep.subr.bf16.mxu0 %v4711_v32  ;;  %3027 = vmatprep.subr.bf16.mxu1 %v4720_v36 }
 0x1bc   :  { %2997 = vmatpush1.bf16.msra.mxu0 %v4732_v42  ;;  %3029 = vmatpush1.bf16.msra.mxu1 %v4741_v46 }
 0x1bd   :  { %2999 = vmatprep.subr.bf16.mxu0 %v4753_v52  ;;  %3031 = vmatprep.subr.bf16.mxu1 %v4762_v56 }
 0x1c0   :  { %3001 = vmatpush1.bf16.msra.mxu0 %v4774_v62  ;;  %3033 = vmatpush1.bf16.msra.mxu1 %v4783_v2 }
 0x1c1   :  { %3003 = vmatprep.subr.bf16.mxu0 %v4795_v7  ;;  %3035 = vmatprep.subr.bf16.mxu1 %v4804_v12 }
 0x1c4   :  { %3005 = vmatpush1.bf16.msra.mxu0 %v4810_v14  ;;  %3037 = vmatpush1.bf16.msra.mxu1 %v4813_v16 }
 0x1c5   :  { %3039 = vmatprep.subr.bf16.mxu0 %v4498_v21  ;;  %3071 = vmatprep.subr.bf16.mxu1 %v4506_v24 }
 0x27a   :  { %v1140_v34 = vpop.f32.mrb[2].mxu0  ;;  %v1211_v35 = vpop.f32.mrb[2].mxu1 }
 0x27b   :  { %v3390_v38 = vadd.f32 %v1140_v34, %v4862_v28  ;;  %v1142_v39 = vpop.f32.mrb[3].mxu0  ;;  %v1213_v41 = vpop.f32.mrb[3].mxu1  ;;  %v3406_v57 = vadd.f32 %v1211_v35, %v4871_v55 }
 0x27c   :  { %v3391_v43 = vadd.f32 %v1142_v39, %v4864_v29  ;;  %v3407_v50 = vadd.f32 %v1213_v41, %v4868_v49 }
 0x27d   :  { %v2498_v45 = vmul.f32 -1.442695, %v3390_v38 }
 0x27e   :  { %v2499_v48 = vmul.f32 -1.442695, %v3391_v43  ;;  %v2500_v53 = vmul.f32 -1.442695, %v3407_v50 }
 0x27f   :  { %3503 = vpow2.f32 %v2498_v45 }
 0x280   :  { %3505 = vpow2.f32 %v2499_v48 }
 0x281   :  { %3507 = vpow2.f32 %v2500_v53 }
 0x282   :  { %3509 = vtanh.f32 %v3406_v57 }
 0x289   :  { %v3504_v59 = vpop.eup %3503 }
 0x28a   :  { %v3506_v60 = vpop.eup %3505  ;;  %v1223_v63 = vadd.f32 1.0, %v3504_v59 }
 0x28b   :  { %v1229_v0 = vadd.f32 1.0, %v3506_v60  ;;  %v3508_v3 = vpop.eup %3507 }
 0x28c   :  { %3511 = vrcp.f32 %v1223_v63  ;;  %v3510_v5 = vpop.eup %3509  ;;  %v1236_v13 = vadd.f32 1.0, %v3508_v3 }
 0x28d   :  { %3513 = vrcp.f32 %v1229_v0 }
 0x28e   :  { %3515 = vrcp.f32 %v1236_v13 }
 0x296   :  { %v3512_v6 = vpop.eup %3511 }
 0x297   :  { %v3514_v9 = vpop.eup %3513  ;;  %v1240_v10 = vmul.f32 %v3512_v6, %v3510_v5 }
 0x298   :  { %v1239_v19 = vmul.f32 %v3514_v9, %v4874_v22  ;;  %v3516_v25 = vpop.eup %3515 }
 0x29a   :  { %v4916_v20 = vadd.f32 %v1240_v10, %v1239_v19 }
 0x29c   :  { %3517 = vtanh.f32 %v4916_v20 }
 0x2a6   :  { %v3518_v26 = vpop.eup %3517 }
 0x2a7   :  { %v1243_v31 = vmul.f32 %v3518_v26, %v3516_v25 }
 0x2a9   :  { %1314 = vmatmul.mubr.f32.vlgmr.msra.gmra.mrb[4].mxu0 %v1243_v31  ;;  %1385 = vmatmul.mubr.f32.vlgmr.msra.gmra.mrb[4].mxu1 %v1243_v31 }
 0x2aa   :  { %3041 = vmatpush1.bf16.msra.mxu0 %v4523_v30  ;;  %3073 = vmatpush1.bf16.msra.mxu1 %v4532_v33 }
 0x2ab   :  { %3043 = vmatprep.subr.bf16.mxu0 %v4544_v37  ;;  %3075 = vmatprep.subr.bf16.mxu1 %v4552_v40 }
 0x2ac   :  { %1488 = vmatprep.mubr.f32.mxu0 %v3619_v17  ;;  %1559 = vmatprep.mubr.f32.mxu1 %v3619_v17 }
 0x2ae   :  { %3045 = vmatpush1.bf16.msra.mxu0 %v4564_v44  ;;  %3077 = vmatpush1.bf16.msra.mxu1 %v4573_v47 }
 0x2af   :  { %3047 = vmatprep.subr.bf16.mxu0 %v4585_v51  ;;  %3079 = vmatprep.subr.bf16.mxu1 %v4594_v54 }
 0x2b2   :  { %3049 = vmatpush1.bf16.msra.mxu0 %v4606_v58  ;;  %3081 = vmatpush1.bf16.msra.mxu1 %v4615_v61 }
 0x2b3   :  { %3051 = vmatprep.subr.bf16.mxu0 %v4627_v1  ;;  %3083 = vmatprep.subr.bf16.mxu1 %v4636_v4 }
 0x2b6   :  { %3053 = vmatpush1.bf16.msra.mxu0 %v4648_v8  ;;  %3085 = vmatpush1.bf16.msra.mxu1 %v4657_v11 }
 0x2b7   :  { %3055 = vmatprep.subr.bf16.mxu0 %v4669_v15  ;;  %3087 = vmatprep.subr.bf16.mxu1 %v4678_v18 }
 0x2ba   :  { %3057 = vmatpush1.bf16.msra.mxu0 %v4690_v23  ;;  %3089 = vmatpush1.bf16.msra.mxu1 %v4699_v27 }
 0x2bb   :  { %3059 = vmatprep.subr.bf16.mxu0 %v4711_v32  ;;  %3091 = vmatprep.subr.bf16.mxu1 %v4720_v36 }
 0x2be   :  { %3061 = vmatpush1.bf16.msra.mxu0 %v4732_v42  ;;  %3093 = vmatpush1.bf16.msra.mxu1 %v4741_v46 }
 0x2bf   :  { %3063 = vmatprep.subr.bf16.mxu0 %v4753_v52  ;;  %3095 = vmatprep.subr.bf16.mxu1 %v4762_v56 }
 0x2c2   :  { %3065 = vmatpush1.bf16.msra.mxu0 %v4774_v62  ;;  %3097 = vmatpush1.bf16.msra.mxu1 %v4783_v2 }
 0x2c3   :  { %3067 = vmatprep.subr.bf16.mxu0 %v4795_v7  ;;  %3099 = vmatprep.subr.bf16.mxu1 %v4804_v12 }
 0x2c6   :  { %3069 = vmatpush1.bf16.msra.mxu0 %v4810_v14  ;;  %3101 = vmatpush1.bf16.msra.mxu1 %v4813_v16 }
 0x2c7   :  { %3103 = vmatprep.subr.bf16.mxu0 %v4498_v21  ;;  %3135 = vmatprep.subr.bf16.mxu1 %v4506_v24 }
 0x37c   :  { %v1315_v22 = vpop.f32.mrb[4].mxu0  ;;  %v1386_v34 = vpop.f32.mrb[4].mxu1 }
 0x37d   :  { %v3392_v35 = vadd.f32 %v1315_v22, %v4862_v28  ;;  %v1317_v38 = vpop.f32.mrb[5].mxu0  ;;  %v1388_v39 = vpop.f32.mrb[5].mxu1  ;;  %v3408_v53 = vadd.f32 %v1386_v34, %v4871_v55 }
 0x37e   :  { %v3393_v41 = vadd.f32 %v1317_v38, %v4864_v29  ;;  %v3409_v48 = vadd.f32 %v1388_v39, %v4868_v49 }
 0x37f   :  { %v2501_v43 = vmul.f32 -1.442695, %v3392_v35 }
 0x380   :  { %v2502_v45 = vmul.f32 -1.442695, %v3393_v41  ;;  %v2503_v50 = vmul.f32 -1.442695, %v3409_v48 }
 0x381   :  { %3519 = vpow2.f32 %v2501_v43 }
 0x382   :  { %3521 = vpow2.f32 %v2502_v45 }
 0x383   :  { %3523 = vpow2.f32 %v2503_v50 }
 0x384   :  { %3525 = vtanh.f32 %v3408_v53 }
 0x38b   :  { %v3520_v57 = vpop.eup %3519 }
 0x38c   :  { %v3522_v59 = vpop.eup %3521  ;;  %v1398_v60 = vadd.f32 1.0, %v3520_v57 }
 0x38d   :  { %v1404_v63 = vadd.f32 1.0, %v3522_v59  ;;  %v3524_v0 = vpop.eup %3523 }
 0x38e   :  { %3527 = vrcp.f32 %v1398_v60  ;;  %v3526_v3 = vpop.eup %3525  ;;  %v1411_v10 = vadd.f32 1.0, %v3524_v0 }
 0x38f   :  { %3529 = vrcp.f32 %v1404_v63 }
 0x390   :  { %3531 = vrcp.f32 %v1411_v10 }
 0x398   :  { %v3528_v5 = vpop.eup %3527 }
 0x399   :  { %v3530_v6 = vpop.eup %3529  ;;  %v1415_v9 = vmul.f32 %v3528_v5, %v3526_v3 }
 0x39a   :  { %v1414_v13 = vmul.f32 %v3530_v6, %v4916_v20  ;;  %v3532_v25 = vpop.eup %3531 }
 0x39c   :  { %v4958_v19 = vadd.f32 %v1415_v9, %v1414_v13 }
 0x39e   :  { %3533 = vtanh.f32 %v4958_v19 }
 0x3a8   :  { %v3534_v26 = vpop.eup %3533 }
 0x3a9   :  { %v1418_v31 = vmul.f32 %v3534_v26, %v3532_v25 }
 0x3ab   :  { %1489 = vmatmul.mubr.f32.vlgmr.msra.gmra.mrb[6].mxu0 %v1418_v31  ;;  %1560 = vmatmul.mubr.f32.vlgmr.msra.gmra.mrb[6].mxu1 %v1418_v31 }
 0x3ac   :  { %3105 = vmatpush1.bf16.msra.mxu0 %v4523_v30  ;;  %3137 = vmatpush1.bf16.msra.mxu1 %v4532_v33 }
 0x3ad   :  { %3107 = vmatprep.subr.bf16.mxu0 %v4544_v37  ;;  %3139 = vmatprep.subr.bf16.mxu1 %v4552_v40 }
 0x3ae   :  { %1663 = vmatprep.mubr.f32.mxu0 %v3619_v17  ;;  %1734 = vmatprep.mubr.f32.mxu1 %v3619_v17 }
 0x3b0   :  { %3109 = vmatpush1.bf16.msra.mxu0 %v4564_v44  ;;  %3141 = vmatpush1.bf16.msra.mxu1 %v4573_v47 }
 0x3b1   :  { %3111 = vmatprep.subr.bf16.mxu0 %v4585_v51  ;;  %3143 = vmatprep.subr.bf16.mxu1 %v4594_v54 }
 0x3b4   :  { %3113 = vmatpush1.bf16.msra.mxu0 %v4606_v58  ;;  %3145 = vmatpush1.bf16.msra.mxu1 %v4615_v61 }
 0x3b5   :  { %3115 = vmatprep.subr.bf16.mxu0 %v4627_v1  ;;  %3147 = vmatprep.subr.bf16.mxu1 %v4636_v4 }
 0x3b8   :  { %3117 = vmatpush1.bf16.msra.mxu0 %v4648_v8  ;;  %3149 = vmatpush1.bf16.msra.mxu1 %v4657_v11 }
 0x3b9   :  { %3119 = vmatprep.subr.bf16.mxu0 %v4669_v15  ;;  %3151 = vmatprep.subr.bf16.mxu1 %v4678_v18 }
 0x3bc   :  { %3121 = vmatpush1.bf16.msra.mxu0 %v4690_v23  ;;  %3153 = vmatpush1.bf16.msra.mxu1 %v4699_v27 }
 0x3bd   :  { %3123 = vmatprep.subr.bf16.mxu0 %v4711_v32  ;;  %3155 = vmatprep.subr.bf16.mxu1 %v4720_v36 }
 0x3c0   :  { %3125 = vmatpush1.bf16.msra.mxu0 %v4732_v42  ;;  %3157 = vmatpush1.bf16.msra.mxu1 %v4741_v46 }
 0x3c1   :  { %3127 = vmatprep.subr.bf16.mxu0 %v4753_v52  ;;  %3159 = vmatprep.subr.bf16.mxu1 %v4762_v56 }
 0x3c4   :  { %3129 = vmatpush1.bf16.msra.mxu0 %v4774_v62  ;;  %3161 = vmatpush1.bf16.msra.mxu1 %v4783_v2 }
 0x3c5   :  { %3131 = vmatprep.subr.bf16.mxu0 %v4795_v7  ;;  %3163 = vmatprep.subr.bf16.mxu1 %v4804_v12 }
 0x3c8   :  { %3133 = vmatpush1.bf16.msra.mxu0 %v4810_v14  ;;  %3165 = vmatpush1.bf16.msra.mxu1 %v4813_v16 }
 0x3c9   :  { %3167 = vmatprep.subr.bf16.mxu0 %v4498_v21  ;;  %3199 = vmatprep.subr.bf16.mxu1 %v4506_v24 }
 0x47e   :  { %v1490_v20 = vpop.f32.mrb[6].mxu0  ;;  %v1561_v22 = vpop.f32.mrb[6].mxu1 }
 0x47f   :  { %v3394_v34 = vadd.f32 %v1490_v20, %v4862_v28  ;;  %v1492_v35 = vpop.f32.mrb[7].mxu0  ;;  %v1563_v38 = vpop.f32.mrb[7].mxu1  ;;  %v3410_v50 = vadd.f32 %v1561_v22, %v4871_v55 }
 0x480   :  { %v3395_v39 = vadd.f32 %v1492_v35, %v4864_v29  ;;  %v3411_v45 = vadd.f32 %v1563_v38, %v4868_v49 }
 0x481   :  { %v2504_v41 = vmul.f32 -1.442695, %v3394_v34 }
 0x482   :  { %v2505_v43 = vmul.f32 -1.442695, %v3395_v39  ;;  %v2506_v48 = vmul.f32 -1.442695, %v3411_v45 }
 0x483   :  { %3535 = vpow2.f32 %v2504_v41 }
 0x484   :  { %3537 = vpow2.f32 %v2505_v43 }
 0x485   :  { %3539 = vpow2.f32 %v2506_v48 }
 0x486   :  { %3541 = vtanh.f32 %v3410_v50 }
 0x48d   :  { %v3536_v53 = vpop.eup %3535 }
 0x48e   :  { %v3538_v57 = vpop.eup %3537  ;;  %v1573_v59 = vadd.f32 1.0, %v3536_v53 }
 0x48f   :  { %v1579_v60 = vadd.f32 1.0, %v3538_v57  ;;  %v3540_v63 = vpop.eup %3539 }
 0x490   :  { %3543 = vrcp.f32 %v1573_v59  ;;  %v3542_v0 = vpop.eup %3541  ;;  %v1586_v9 = vadd.f32 1.0, %v3540_v63 }
 0x491   :  { %3545 = vrcp.f32 %v1579_v60 }
 0x492   :  { %3547 = vrcp.f32 %v1586_v9 }
 0x49a   :  { %v3544_v3 = vpop.eup %3543 }
 0x49b   :  { %v3546_v5 = vpop.eup %3545  ;;  %v1590_v6 = vmul.f32 %v3544_v3, %v3542_v0 }
 0x49c   :  { %v1589_v10 = vmul.f32 %v3546_v5, %v4958_v19  ;;  %v3548_v25 = vpop.eup %3547 }
 0x49e   :  { %v5000_v13 = vadd.f32 %v1590_v6, %v1589_v10 }
 0x4a0   :  { %3549 = vtanh.f32 %v5000_v13 }
 0x4aa   :  { %v3550_v26 = vpop.eup %3549 }
 0x4ab   :  { %v1593_v31 = vmul.f32 %v3550_v26, %v3548_v25 }
 0x4ad   :  { %1664 = vmatmul.mubr.f32.vlgmr.msra.gmra.mrb[8].mxu0 %v1593_v31  ;;  %1735 = vmatmul.mubr.f32.vlgmr.msra.gmra.mrb[8].mxu1 %v1593_v31 }
 0x4ae   :  { %3169 = vmatpush1.bf16.msra.mxu0 %v4523_v30  ;;  %3201 = vmatpush1.bf16.msra.mxu1 %v4532_v33 }
 0x4af   :  { %3171 = vmatprep.subr.bf16.mxu0 %v4544_v37  ;;  %3203 = vmatprep.subr.bf16.mxu1 %v4552_v40 }
 0x4b0   :  { %1838 = vmatprep.mubr.f32.mxu0 %v3619_v17  ;;  %1909 = vmatprep.mubr.f32.mxu1 %v3619_v17 }
 0x4b2   :  { %3173 = vmatpush1.bf16.msra.mxu0 %v4564_v44  ;;  %3205 = vmatpush1.bf16.msra.mxu1 %v4573_v47 }
 0x4b3   :  { %3175 = vmatprep.subr.bf16.mxu0 %v4585_v51  ;;  %3207 = vmatprep.subr.bf16.mxu1 %v4594_v54 }
 0x4b6   :  { %3177 = vmatpush1.bf16.msra.mxu0 %v4606_v58  ;;  %3209 = vmatpush1.bf16.msra.mxu1 %v4615_v61 }
 0x4b7   :  { %3179 = vmatprep.subr.bf16.mxu0 %v4627_v1  ;;  %3211 = vmatprep.subr.bf16.mxu1 %v4636_v4 }
 0x4ba   :  { %3181 = vmatpush1.bf16.msra.mxu0 %v4648_v8  ;;  %3213 = vmatpush1.bf16.msra.mxu1 %v4657_v11 }
 0x4bb   :  { %3183 = vmatprep.subr.bf16.mxu0 %v4669_v15  ;;  %3215 = vmatprep.subr.bf16.mxu1 %v4678_v18 }
 0x4be   :  { %3185 = vmatpush1.bf16.msra.mxu0 %v4690_v23  ;;  %3217 = vmatpush1.bf16.msra.mxu1 %v4699_v27 }
 0x4bf   :  { %3187 = vmatprep.subr.bf16.mxu0 %v4711_v32  ;;  %3219 = vmatprep.subr.bf16.mxu1 %v4720_v36 }
 0x4c2   :  { %3189 = vmatpush1.bf16.msra.mxu0 %v4732_v42  ;;  %3221 = vmatpush1.bf16.msra.mxu1 %v4741_v46 }
 0x4c3   :  { %3191 = vmatprep.subr.bf16.mxu0 %v4753_v52  ;;  %3223 = vmatprep.subr.bf16.mxu1 %v4762_v56 }
 0x4c6   :  { %3193 = vmatpush1.bf16.msra.mxu0 %v4774_v62  ;;  %3225 = vmatpush1.bf16.msra.mxu1 %v4783_v2 }
 0x4c7   :  { %3195 = vmatprep.subr.bf16.mxu0 %v4795_v7  ;;  %3227 = vmatprep.subr.bf16.mxu1 %v4804_v12 }
 0x4ca   :  { %3197 = vmatpush1.bf16.msra.mxu0 %v4810_v14  ;;  %3229 = vmatpush1.bf16.msra.mxu1 %v4813_v16 }
 0x4cb   :  { %3231 = vmatprep.subr.bf16.mxu0 %v4498_v21  ;;  %3263 = vmatprep.subr.bf16.mxu1 %v4506_v24 }
 0x580   :  { %v1665_v19 = vpop.f32.mrb[8].mxu0  ;;  %v1736_v20 = vpop.f32.mrb[8].mxu1 }
 0x581   :  { %v3396_v22 = vadd.f32 %v1665_v19, %v4862_v28  ;;  %v1667_v34 = vpop.f32.mrb[9].mxu0  ;;  %v1738_v35 = vpop.f32.mrb[9].mxu1  ;;  %v3412_v48 = vadd.f32 %v1736_v20, %v4871_v55 }
 0x582   :  { %v3397_v38 = vadd.f32 %v1667_v34, %v4864_v29  ;;  %v3413_v43 = vadd.f32 %v1738_v35, %v4868_v49 }
 0x583   :  { %v2507_v39 = vmul.f32 -1.442695, %v3396_v22 }
 0x584   :  { %v2508_v41 = vmul.f32 -1.442695, %v3397_v38  ;;  %v2509_v45 = vmul.f32 -1.442695, %v3413_v43 }
 0x585   :  { %3551 = vpow2.f32 %v2507_v39 }
 0x586   :  { %3553 = vpow2.f32 %v2508_v41 }
 0x587   :  { %3555 = vpow2.f32 %v2509_v45 }
 0x588   :  { %3557 = vtanh.f32 %v3412_v48 }
 0x58f   :  { %v3552_v50 = vpop.eup %3551 }
 0x590   :  { %v3554_v53 = vpop.eup %3553  ;;  %v1748_v57 = vadd.f32 1.0, %v3552_v50 }
 0x591   :  { %v1754_v59 = vadd.f32 1.0, %v3554_v53  ;;  %v3556_v60 = vpop.eup %3555 }
 0x592   :  { %3559 = vrcp.f32 %v1748_v57  ;;  %v3558_v63 = vpop.eup %3557  ;;  %v1761_v6 = vadd.f32 1.0, %v3556_v60 }
 0x593   :  { %3561 = vrcp.f32 %v1754_v59 }
 0x594   :  { %3563 = vrcp.f32 %v1761_v6 }
 0x59c   :  { %v3560_v0 = vpop.eup %3559 }
 0x59d   :  { %v3562_v3 = vpop.eup %3561  ;;  %v1765_v5 = vmul.f32 %v3560_v0, %v3558_v63 }
 0x59e   :  { %v1764_v9 = vmul.f32 %v3562_v3, %v5000_v13  ;;  %v3564_v25 = vpop.eup %3563 }
 0x5a0   :  { %v5042_v10 = vadd.f32 %v1765_v5, %v1764_v9 }
 0x5a2   :  { %3565 = vtanh.f32 %v5042_v10 }
 0x5ac   :  { %v3566_v26 = vpop.eup %3565 }
 0x5ad   :  { %v1768_v31 = vmul.f32 %v3566_v26, %v3564_v25  ;;  %v2302_v26 = vld [vmem:[%s5210_s4 + $0x18] sm:$0xff] }
 0x5af   :  { %1839 = vmatmul.mubr.f32.vlgmr.msra.gmra.mrb[10].mxu0 %v1768_v31  ;;  %1910 = vmatmul.mubr.f32.vlgmr.msra.gmra.mrb[10].mxu1 %v1768_v31 }
 0x5b0   :  { %3233 = vmatpush1.bf16.msra.mxu0 %v4523_v30  ;;  %3265 = vmatpush1.bf16.msra.mxu1 %v4532_v33 }
 0x5b1   :  { %3235 = vmatprep.subr.bf16.mxu0 %v4544_v37  ;;  %3267 = vmatprep.subr.bf16.mxu1 %v4552_v40 }
 0x5b2   :  { %2013 = vmatprep.mubr.f32.mxu0 %v3619_v17  ;;  %2084 = vmatprep.mubr.f32.mxu1 %v3619_v17 }
 0x5b4   :  { %3237 = vmatpush1.bf16.msra.mxu0 %v4564_v44  ;;  %3269 = vmatpush1.bf16.msra.mxu1 %v4573_v47 }
 0x5b5   :  { %3239 = vmatprep.subr.bf16.mxu0 %v4585_v51  ;;  %3271 = vmatprep.subr.bf16.mxu1 %v4594_v54 }
 0x5b8   :  { %3241 = vmatpush1.bf16.msra.mxu0 %v4606_v58  ;;  %3273 = vmatpush1.bf16.msra.mxu1 %v4615_v61 }
 0x5b9   :  { %3243 = vmatprep.subr.bf16.mxu0 %v4627_v1  ;;  %3275 = vmatprep.subr.bf16.mxu1 %v4636_v4 }
 0x5bc   :  { %3245 = vmatpush1.bf16.msra.mxu0 %v4648_v8  ;;  %3277 = vmatpush1.bf16.msra.mxu1 %v4657_v11 }
 0x5bd   :  { %3247 = vmatprep.subr.bf16.mxu0 %v4669_v15  ;;  %3279 = vmatprep.subr.bf16.mxu1 %v4678_v18 }
 0x5c0   :  { %3249 = vmatpush1.bf16.msra.mxu0 %v4690_v23  ;;  %3281 = vmatpush1.bf16.msra.mxu1 %v4699_v27 }
 0x5c1   :  { %3251 = vmatprep.subr.bf16.mxu0 %v4711_v32  ;;  %3283 = vmatprep.subr.bf16.mxu1 %v4720_v36 }
 0x5c4   :  { %3253 = vmatpush1.bf16.msra.mxu0 %v4732_v42  ;;  %3285 = vmatpush1.bf16.msra.mxu1 %v4741_v46 }
 0x5c5   :  { %3255 = vmatprep.subr.bf16.mxu0 %v4753_v52  ;;  %3287 = vmatprep.subr.bf16.mxu1 %v4762_v56 }
 0x5c8   :  { %3257 = vmatpush1.bf16.msra.mxu0 %v4774_v62  ;;  %3289 = vmatpush1.bf16.msra.mxu1 %v4783_v2 }
 0x5c9   :  { %3259 = vmatprep.subr.bf16.mxu0 %v4795_v7  ;;  %3291 = vmatprep.subr.bf16.mxu1 %v4804_v12 }
 0x5cc   :  { %3261 = vmatpush1.bf16.msra.mxu0 %v4810_v14  ;;  %3293 = vmatpush1.bf16.msra.mxu1 %v4813_v16 }
 0x5cd   :  { %3295 = vmatprep.subr.bf16.mxu0 %v4498_v21  ;;  %3327 = vmatprep.subr.bf16.mxu1 %v4506_v24 }
 0x682   :  { %v1840_v13 = vpop.f32.mrb[10].mxu0  ;;  %v1911_v19 = vpop.f32.mrb[10].mxu1 }
 0x683   :  { %v3398_v20 = vadd.f32 %v1840_v13, %v4862_v28  ;;  %v1842_v22 = vpop.f32.mrb[11].mxu0  ;;  %v1913_v34 = vpop.f32.mrb[11].mxu1  ;;  %v3414_v45 = vadd.f32 %v1911_v19, %v4871_v55  ;;  %v2303_v13 = vld [vmem:[%s5210_s4 + $0x20] sm:$0xff]  ;;  %v2304_v19 = vld [vmem:[%s5210_s4 + $0x28] sm:$0xff] }
 0x684   :  { %v3399_v35 = vadd.f32 %v1842_v22, %v4864_v29  ;;  %v3415_v41 = vadd.f32 %v1913_v34, %v4868_v49  ;;  %v2305_v22 = vld [vmem:[%s5210_s4 + $0x30] sm:$0xff]  ;;  %v2306_v34 = vld [vmem:[%s5210_s4 + $0x38] sm:$0xff] }
 0x685   :  { %v2510_v38 = vmul.f32 -1.442695, %v3398_v20  ;;  %v3365_v20 = vpack.c.bf16 %v2304_v19, %v2303_v13 }
 0x686   :  { %v2511_v39 = vmul.f32 -1.442695, %v3399_v35  ;;  %v2512_v43 = vmul.f32 -1.442695, %v3415_v41  ;;  %v3368_v35 = vpack.c.bf16 %v2306_v34, %v2305_v22 }
 0x687   :  { %3567 = vpow2.f32 %v2510_v38  ;;  %v2307_v38 = vld [vmem:[%s5210_s4 + $0x40] sm:$0xff] }
 0x688   :  { %3569 = vpow2.f32 %v2511_v39  ;;  %v2308_v39 = vld [vmem:[%s5210_s4 + $0x48] sm:$0xff] }
 0x689   :  { %3571 = vpow2.f32 %v2512_v43  ;;  %v3371_v41 = vpack.c.bf16 %v2308_v39, %v2307_v38  ;;  %v2309_v43 = vld [vmem:[%s5210_s4 + $0x50] sm:$0xff] }
 0x68a   :  { %3573 = vtanh.f32 %v3414_v45  ;;  %v2310_v45 = vld [vmem:[%s5210_s4 + $0x58] sm:$0xff] }
 0x691   :  { %v3568_v21 = vpop.eup %3567 }
 0x692   :  { %v3570_v48 = vpop.eup %3569  ;;  %v1923_v24 = vadd.f32 1.0, %v3568_v21  ;;  %v2311_v21 = vld [vmem:[%s5210_s4 + $0x60] sm:$0xff] }
 0x693   :  { %v1929_v50 = vadd.f32 1.0, %v3570_v48  ;;  %v3572_v53 = vpop.eup %3571  ;;  %v3374_v48 = vpack.c.bf16 %v2310_v45, %v2309_v43 }
 0x694   :  { %3575 = vrcp.f32 %v1923_v24  ;;  %v3574_v57 = vpop.eup %3573  ;;  %v1936_v0 = vadd.f32 1.0, %v3572_v53  ;;  %v2312_v24 = vld [vmem:[%s5210_s4 + $0x68] sm:$0xff]  ;;  %v2313_v53 = vld [vmem:[%s5210_s4 + $0x70] sm:$0xff] }
 0x695   :  { %3577 = vrcp.f32 %v1929_v50  ;;  %v3377_v50 = vpack.c.bf16 %v2312_v24, %v2311_v21 }
 0x696   :  { %3579 = vrcp.f32 %v1936_v0 }
 0x69e   :  { %v3576_v59 = vpop.eup %3575 }
 0x69f   :  { %v3578_v60 = vpop.eup %3577  ;;  %v1940_v63 = vmul.f32 %v3576_v59, %v3574_v57  ;;  %v2314_v57 = vld [vmem:[%s5210_s4 + $0x78] sm:$0xff] }
 0x6a0   :  { %v1939_v3 = vmul.f32 %v3578_v60, %v5042_v10  ;;  %v3580_v6 = vpop.eup %3579  ;;  %v2301_v10 = vld [vmem:[%s5210_s4 + $0x10] sm:$0xff]  ;;  %v3380_v59 = vpack.c.bf16 %v2314_v57, %v2313_v53  ;;  %v2392_v60 = vld [vmem:[%s5211_s6] sm:$0xff] }
 0x6a1   :  { %v3362_v31 = vpack.c.bf16 %v2302_v26, %v2301_v10 }
 0x6a2   :  { %v5084_v5 = vadd.f32 %v1940_v63, %v1939_v3 }
 0x6a4   :  { %3581 = vtanh.f32 %v5084_v5 }
 0x6ae   :  { %v3582_v9 = vpop.eup %3581 }
 0x6af   :  { %v1943_v25 = vmul.f32 %v3582_v9, %v3580_v6 }
 0x6b1   :  { %2014 = vmatmul.mubr.f32.vlgmr.msra.gmra.mrb[12].mxu0 %v1943_v25  ;;  %2085 = vmatmul.mubr.f32.vlgmr.msra.gmra.mrb[12].mxu1 %v1943_v25 }
 0x6b2   :  { %3297 = vmatpush1.bf16.msra.mxu0 %v4523_v30  ;;  %3329 = vmatpush1.bf16.msra.mxu1 %v4532_v33 }
 0x6b3   :  { %3299 = vmatprep.subr.bf16.mxu0 %v4544_v37  ;;  %3331 = vmatprep.subr.bf16.mxu1 %v4552_v40 }
 0x6b4   :  { %2188 = vmatprep.mubr.f32.mxu0 %v3619_v17  ;;  %2259 = vmatprep.mubr.f32.mxu1 %v3619_v17 }
 0x6b6   :  { %3301 = vmatpush1.bf16.msra.mxu0 %v4564_v44  ;;  %3333 = vmatpush1.bf16.msra.mxu1 %v4573_v47 }
 0x6b7   :  { %3303 = vmatprep.subr.bf16.mxu0 %v4585_v51  ;;  %3335 = vmatprep.subr.bf16.mxu1 %v4594_v54 }
 0x6ba   :  { %3305 = vmatpush1.bf16.msra.mxu0 %v4606_v58  ;;  %3337 = vmatpush1.bf16.msra.mxu1 %v4615_v61 }
 0x6bb   :  { %3307 = vmatprep.subr.bf16.mxu0 %v4627_v1  ;;  %3339 = vmatprep.subr.bf16.mxu1 %v4636_v4 }
 0x6be   :  { %3309 = vmatpush1.bf16.msra.mxu0 %v4648_v8  ;;  %3341 = vmatpush1.bf16.msra.mxu1 %v4657_v11 }
 0x6bf   :  { %3311 = vmatprep.subr.bf16.mxu0 %v4669_v15  ;;  %3343 = vmatprep.subr.bf16.mxu1 %v4678_v18 }
 0x6c2   :  { %3313 = vmatpush1.bf16.msra.mxu0 %v4690_v23  ;;  %3345 = vmatpush1.bf16.msra.mxu1 %v4699_v27 }
 0x6c3   :  { %3315 = vmatprep.subr.bf16.mxu0 %v4711_v32  ;;  %3347 = vmatprep.subr.bf16.mxu1 %v4720_v36 }
 0x6c6   :  { %3317 = vmatpush1.bf16.msra.mxu0 %v4732_v42  ;;  %3349 = vmatpush1.bf16.msra.mxu1 %v4741_v46 }
 0x6c7   :  { %3319 = vmatprep.subr.bf16.mxu0 %v4753_v52  ;;  %3351 = vmatprep.subr.bf16.mxu1 %v4762_v56 }
 0x6ca   :  { %3321 = vmatpush1.bf16.msra.mxu0 %v4774_v62  ;;  %3353 = vmatpush1.bf16.msra.mxu1 %v4783_v2 }
 0x6cb   :  { %3323 = vmatprep.subr.bf16.mxu0 %v4795_v7  ;;  %3355 = vmatprep.subr.bf16.mxu1 %v4804_v12  ;;  %v2299_v7 = vld [vmem:[%s5210_s4] sm:$0xff]  ;;  %v2300_v12 = vld [vmem:[%s5210_s4 + $0x8] sm:$0xff] }
 0x6ce   :  { %3325 = vmatpush1.bf16.msra.mxu0 %v4810_v14  ;;  %3357 = vmatpush1.bf16.msra.mxu1 %v4813_v16  ;;  %v3359_v14 = vpack.c.bf16 %v2300_v12, %v2299_v7  ;;  %v3620_v16 = vmov 0.0|0.0  }
 0x6cf   :  { %3358 = vmatprep.subr.bf16.mxu0 %v3620_v16  ;;  %3382 = vmatprep.subr.bf16.mxu1 %v3620_v16 }
 0x784   :  { %v2015_v30 = vpop.f32.mrb[12].mxu0  ;;  %v2086_v33 = vpop.f32.mrb[12].mxu1 }
 0x785   :  { %v3400_v37 = vadd.f32 %v2015_v30, %v4862_v28  ;;  %v2017_v40 = vpop.f32.mrb[13].mxu0  ;;  %v2088_v44 = vpop.f32.mrb[13].mxu1  ;;  %v3416_v1 = vadd.f32 %v2086_v33, %v4871_v55 }
 0x786   :  { %v3401_v47 = vadd.f32 %v2017_v40, %v4864_v29  ;;  %v3417_v58 = vadd.f32 %v2088_v44, %v4868_v49 }
 0x787   :  { %v2513_v51 = vmul.f32 -1.442695, %v3400_v37 }
 0x788   :  { %v2514_v54 = vmul.f32 -1.442695, %v3401_v47  ;;  %v2515_v61 = vmul.f32 -1.442695, %v3417_v58 }
 0x789   :  { %3583 = vpow2.f32 %v2513_v51 }
 0x78a   :  { %3585 = vpow2.f32 %v2514_v54 }
 0x78b   :  { %3587 = vpow2.f32 %v2515_v61 }
 0x78c   :  { %3589 = vtanh.f32 %v3416_v1 }
 0x793   :  { %v3584_v4 = vpop.eup %3583 }
 0x794   :  { %v3586_v8 = vpop.eup %3585  ;;  %v2098_v11 = vadd.f32 1.0, %v3584_v4 }
 0x795   :  { %v2104_v15 = vadd.f32 1.0, %v3586_v8  ;;  %v3588_v18 = vpop.eup %3587 }
 0x796   :  { %3591 = vrcp.f32 %v2098_v11  ;;  %v3590_v23 = vpop.eup %3589  ;;  %v2111_v42 = vadd.f32 1.0, %v3588_v18 }
 0x797   :  { %3593 = vrcp.f32 %v2104_v15 }
 0x798   :  { %3595 = vrcp.f32 %v2111_v42 }
 0x7a0   :  { %v3592_v27 = vpop.eup %3591 }
 0x7a1   :  { %v3594_v32 = vpop.eup %3593  ;;  %v2115_v36 = vmul.f32 %v3592_v27, %v3590_v23  ;;  %v2394_v23 = vld [vmem:[%s5211_s6 + $0x10] sm:$0xff]  ;;  %v2395_v27 = vld [vmem:[%s5211_s6 + $0x18] sm:$0xff] }
 0x7a2   :  { %v2114_v46 = vmul.f32 %v3594_v32, %v5084_v5  ;;  %v3596_v56 = vpop.eup %3595  ;;  %v3386_v32 = vpack.c.bf16 %v2395_v27, %v2394_v23 }
 0x7a4   :  { %v5124_v52 = vadd.f32 %v2115_v36, %v2114_v46  ;;  %v2519_v36 = vld [vmem:[%s5212_s5] ss:$0 sm:$0xff] }
 0x7a6   :  { %3597 = vtanh.f32 %v5124_v52 }
 0x7b0   :  { %v3598_v62 = vpop.eup %3597 }
 0x7b1   :  { %v2118_v2 = vmul.f32 %v3598_v62, %v3596_v56  ;;  %v2520_v56 = vld [vmem:[%s5213_s7] ss:$0 sm:$0xff] }
 0x7b3   :  { %2189 = vmatmul.mubr.f32.vlgmr.msra.gmra.mrb[14].mxu0 %v2118_v2  ;;  %2260 = vmatmul.mubr.f32.vlgmr.msra.gmra.mrb[14].mxu1 %v2118_v2 }
 0x7b4   :  { %3360 = vmatpush3.bf16.msra.mxu0 %v3359_v14  ;;  %2576 = vmatprep.mubr.msk.f32.mxu0 %vm3621_vm0, %v3619_v17 }
 0x7b5   :  { %3361 = vmatprep.subr.bf16.mxu0 %v3620_v16  ;;  %2587 = vmatprep.mubr.msk.f32.mxu1 %vm3621_vm0, %v3619_v17  ;;  %v2393_v17 = vld [vmem:[%s5211_s6 + $0x8] sm:$0xff] }
 0x7b6   :  { %v3383_v63 = vpack.c.bf16 %v2393_v17, %v2392_v60 }
 0x7b8   :  { %3363 = vmatpush3.bf16.msra.mxu0 %v3362_v31  ;;  %3384 = vmatpush3.bf16.msra.mxu1 %v3383_v63 }
 0x7b9   :  { %3364 = vmatprep.subr.bf16.mxu0 %v3620_v16  ;;  %3385 = vmatprep.subr.bf16.mxu1 %v3620_v16 }
 0x7bc   :  { %3366 = vmatpush3.bf16.msra.mxu0 %v3365_v20  ;;  %3387 = vmatpush3.bf16.msra.mxu1 %v3386_v32 }
 0x7bd   :  { %3367 = vmatprep.subr.bf16.mxu0 %v3620_v16 }
 0x7c0   :  { %3369 = vmatpush3.bf16.msra.mxu0 %v3368_v35 }
 0x7c1   :  { %3370 = vmatprep.subr.bf16.mxu0 %v3620_v16 }
 0x7c4   :  { %3372 = vmatpush3.bf16.msra.mxu0 %v3371_v41 }
 0x7c5   :  { %3373 = vmatprep.subr.bf16.mxu0 %v3620_v16 }
 0x7c8   :  { %3375 = vmatpush3.bf16.msra.mxu0 %v3374_v48 }
 0x7c9   :  { %3376 = vmatprep.subr.bf16.mxu0 %v3620_v16 }
 0x7cc   :  { %3378 = vmatpush3.bf16.msra.mxu0 %v3377_v50 }
 0x7cd   :  { %3379 = vmatprep.subr.bf16.mxu0 %v3620_v16 }
 0x7d0   :  { %3381 = vmatpush3.bf16.msra.mxu0 %v3380_v59 }
 0x886   :  { %v2190_v0 = vpop.f32.mrb[14].mxu0  ;;  %v2261_v3 = vpop.f32.mrb[14].mxu1 }
 0x887   :  { %v3402_v5 = vadd.f32 %v2190_v0, %v4862_v28  ;;  %v2192_v6 = vpop.f32.mrb[15].mxu0  ;;  %v2263_v9 = vpop.f32.mrb[15].mxu1  ;;  %v3418_v44 = vadd.f32 %v2261_v3, %v4871_v55 }
 0x888   :  { %v3403_v25 = vadd.f32 %v2192_v6, %v4864_v29  ;;  %v3419_v37 = vadd.f32 %v2263_v9, %v4868_v49 }
 0x889   :  { %v2516_v30 = vmul.f32 -1.442695, %v3402_v5 }
 0x88a   :  { %v2517_v33 = vmul.f32 -1.442695, %v3403_v25  ;;  %v2518_v40 = vmul.f32 -1.442695, %v3419_v37 }
 0x88b   :  { %3599 = vpow2.f32 %v2516_v30 }
 0x88c   :  { %3601 = vpow2.f32 %v2517_v33 }
 0x88d   :  { %3603 = vpow2.f32 %v2518_v40 }
 0x88e   :  { %3605 = vtanh.f32 %v3418_v44 }
 0x895   :  { %v3600_v47 = vpop.eup %3599 }
 0x896   :  { %v3602_v51 = vpop.eup %3601  ;;  %v2273_v54 = vadd.f32 1.0, %v3600_v47 }
 0x897   :  { %v2279_v58 = vadd.f32 1.0, %v3602_v51  ;;  %v3604_v28 = vpop.eup %3603 }
 0x898   :  { %3607 = vrcp.f32 %v2273_v54  ;;  %v3606_v61 = vpop.eup %3605  ;;  %v2286_v8 = vadd.f32 1.0, %v3604_v28 }
 0x899   :  { %3609 = vrcp.f32 %v2279_v58 }
 0x89a   :  { %3611 = vrcp.f32 %v2286_v8 }
 0x8a2   :  { %v3608_v29 = vpop.eup %3607 }
 0x8a3   :  { %v3610_v1 = vpop.eup %3609  ;;  %v2290_v4 = vmul.f32 %v3608_v29, %v3606_v61 }
 0x8a4   :  { %v2289_v11 = vmul.f32 %v3610_v1, %v5124_v52  ;;  %v3612_v55 = vpop.eup %3611 }
 0x8a6   :  { %v2291_v49 = vadd.f32 %v2290_v4, %v2289_v11 }
 0x8a8   :  { %3613 = vtanh.f32 %v2291_v49 }
 0x8b2   :  { %v3614_v15 = vpop.eup %3613 }
 0x8b3   :  { %v2293_v18 = vmul.f32 %v3614_v15, %v3612_v55 }
 0x8b5   :  { %2577 = vmatmul.mubr.f32.vlgmr.msra.gmra.mrb[16].mxu0 %v2293_v18 }
 0x988   :  { %v2388_v42 = vpop.f32.mrb[16].mxu0 }
 0x989   :  { %v2389_v46 = vadd.f32 %v2519_v36, %v2388_v42  ;;  %v2578_v52 = vpop.f32.mrb[17].mxu0 }
 0x98b   :  { %2588 = vmatmul.mubr.msk.f32.vlgmr.msra.gmra.mrb[16].mxu1 %vm2403_vm1, %v2389_v46 }
 0xa5e   :  { %v2473_v62 = vpop.f32.mrb[16].mxu1 }
 0xa5f   :  { %v2474_v2 = vadd.f32 %v2520_v56, %v2473_v62  ;;  %v2589_v7 = vpop.f32.mrb[17].mxu1 }
 0xa61   :  { %v2478_v12 = vsel %vm2477_vm2, %v2474_v2, -inf }
 0xa62   :  { %2479 = vmax.xlane.f32.xlu0 %v2478_v12 }
 0xaef   :  { %v2480_v14 = vpop.xlane.xlu0 %2479 }
 0xaf0   :  { %v2481_v16 = vsub.f32 %v2474_v2, %v2480_v14 }
 0xaf2   :  { %v2482_v10 = vmul.f32 1.442695, %v2481_v16 }
 0xaf4   :  { %3615 = vpow2.f32 %v2482_v10 }
 0xafe   :  { %v3616_v26 = vpop.eup %3615 }
 0xaff   :  { %v2484_v31 = vsel %vm2477_vm2, %v3616_v26, 0.0 }
 0xb00   :  { %2485 = vadd.xlane.f32.xlu0 %v2484_v31 }
 0xb8d   :  { %v2486_v13 = vpop.xlane.xlu0 %2485 }
 0xb8e   :  { %3617 = vlog2.f32 %v2486_v13 }
 0xb98   :  { %v3618_v19 = vpop.eup %3617 }
 0xb99   :  { %v2488_v20 = vmul.f32 0.6931472, %v3618_v19 }
 0xb9b   :  { %v2489_v22 = vsub.f32 %v2481_v16, %v2488_v20 }
 0xb9d   :  { %2490 = vst.msk [vmem:[%s5214_s8] sm:$0xff] %vm2477_vm2, %v2489_v22 }

</bundles_post_ra>
